<compile_context>
chip_gen: v7x
topology: tpu7x:2x2x1
jax: 0.10.0
libtpu: 0.0.40
codegen_flags: <defaults>
</compile_context>

<pallas_src>
import functools

import jax
import jax.numpy as jnp
from jax.experimental import pallas as pl
from jax.experimental.pallas import tpu as pltpu


LANE = 128  # lane width / padding granule


def _round_up(x, m):
    return ((x + m - 1) // m) * m


# ----------------------------- Pallas kernel --------------------------------

def _gin7_fused_kernel(a_ref, x_ref, *rest, reassoc):
    """Fused 7-layer GIN forward.

    a_ref : [Np, Np] f32   padded A_hat (zeros outside the valid NxN block)
    x_ref : [Np, Cp] f32   padded node features
    rest  : w1..w7 ([Cp,Cp] f32), b1..b7 ([1,Cp] f32), o_ref ([Np,Cp] f32)
    reassoc : static tuple[bool] per layer; True -> compute A @ (H @ W).
    """
    n_layers = len(reassoc)
    w_refs = rest[:n_layers]
    b_refs = rest[n_layers:2 * n_layers]
    o_ref = rest[2 * n_layers]

    a = a_ref[...]                      # f32 [Np, Np], loaded once, reused 7x
    h = x_ref[...]                      # f32 [Np, Cp]

    for i in range(n_layers):           # static, unrolled layer loop
        w = w_refs[i][...]
        b = b_refs[i][...]
        if reassoc[i]:
            # Head: A_hat @ (H @ W) -- cheaper when C_out < C_in.
            hw = jnp.dot(h, w, preferred_element_type=jnp.float32)
            h = jnp.dot(a, hw, preferred_element_type=jnp.float32) + b
        else:
            # (A_hat @ H) @ W -- all f32, MXU with f32 accumulation.
            agg = jnp.dot(a, h, preferred_element_type=jnp.float32)
            h = jnp.dot(agg, w, preferred_element_type=jnp.float32) + b
        if i < n_layers - 1:            # ReLU after layers 1..6, not after 7
            h = jnp.maximum(h, 0.0)

    o_ref[...] = h.astype(o_ref.dtype)


def gin7_forward(a_hat_p, x_p, padded_params, reassoc):
    """Single fused pallas_call over padded, VMEM-resident operands."""
    n_pad, c_pad = x_p.shape
    ws = [w for w, _ in padded_params]
    bs = [b for _, b in padded_params]
    vmem = pl.BlockSpec(memory_space=pltpu.MemorySpace.VMEM)
    kernel = functools.partial(_gin7_fused_kernel, reassoc=tuple(reassoc))
    return pl.pallas_call(
        kernel,
        out_shape=jax.ShapeDtypeStruct((n_pad, c_pad), jnp.float32),
        in_specs=[vmem] * (2 + 2 * len(padded_params)),
        out_specs=vmem,
    )(a_hat_p, x_p, *ws, *bs)


# --------------------------- Host-side preparation ---------------------------

def init_params(key, input_dim, output_dim, hidden_dim):
    """Deterministic parameter init. Linear weights stored as [C_in, C_out]."""
    dims = [input_dim] + [hidden_dim] * 6 + [output_dim]
    params = []
    for i in range(7):
        key, kw, kb = jax.random.split(key, 3)
        fan_in = dims[i]
        bound = 1.0 / float(jnp.sqrt(jnp.float32(fan_in)))
        w = jax.random.uniform(kw, (dims[i], dims[i + 1]), jnp.float32,
                               minval=-bound, maxval=bound)
        bb = jax.random.uniform(kb, (dims[i + 1],), jnp.float32,
                                minval=-bound, maxval=bound)
        params.append((w, bb))
    return params


def build_a_hat_padded(edge_index, num_nodes, n_pad, eps=0.0):
    """Zero-padded [n_pad, n_pad] A_hat = A + (1+eps) I, float32."""
    src, dst = edge_index[0], edge_index[1]
    a = jnp.zeros((n_pad, n_pad), jnp.float32)
    a = a.at[dst, src].add(1.0)
    diag = jnp.arange(num_nodes)
    a = a.at[diag, diag].add(1.0 + eps)
    return a


def pad_features(x, n_pad, c_pad):
    n, c = x.shape
    return jnp.zeros((n_pad, c_pad), x.dtype).at[:n, :c].set(x)


def pad_params(params, c_pad):
    padded = []
    for w, b in params:
        cin, cout = w.shape
        wp = jnp.zeros((c_pad, c_pad), jnp.float32).at[:cin, :cout].set(w)
        bp = jnp.zeros((1, c_pad), jnp.float32).at[0, :cout].set(b)
        padded.append((wp, bp))
    return padded


# ----------------------------- Model wrapper ---------------------------------

def gin_classifier_7_layer(x, edge_index, params, *, eps=0.0):
    """Full forward pass: pad once, run the fused kernel, slice the result."""
    n, _ = x.shape
    out_dim = params[-1][0].shape[1]
    all_dims = [params[0][0].shape[0]] + [w.shape[1] for w, _ in params]
    c_pad = _round_up(max(all_dims), LANE)
    n_pad = _round_up(n, LANE)

    # Built once per graph (hoisted out of the layer loop; reusable across calls).
    a_hat_p = build_a_hat_padded(edge_index, n, n_pad, eps)
    x_p = pad_features(x, n_pad, c_pad)
    p_pad = pad_params(params, c_pad)
    reassoc = [w.shape[1] < w.shape[0] for w, _ in params]  # head layer: True

    out_p = gin7_forward(a_hat_p, x_p, p_pad, reassoc)
    return out_p[:n, :out_dim]


# Pure-JAX reference in float32 (true module semantics, standard association).
def _reference(x, edge_index, params, *, eps=0.0):
    n = x.shape[0]
    src, dst = edge_index[0], edge_index[1]
    a = jnp.zeros((n, n), jnp.float32).at[dst, src].add(1.0)
    a = a + (1.0 + eps) * jnp.eye(n, dtype=jnp.float32)
    h = x
    for i, (w, b) in enumerate(params):
        agg = jnp.dot(a, h, preferred_element_type=jnp.float32)
        h = jnp.dot(agg, w, preferred_element_type=jnp.float32) + b[None, :]
        if i < len(params) - 1:
            h = jnp.maximum(h, 0.0)
    return h


# ---------------------------------- main -------------------------------------

if __name__ == "__main__":
    key = jax.random.PRNGKey(0)

    num_nodes = 16
    input_dim = 8
    hidden_dim = 32
    output_dim = 4
    num_edges = 40

    key, kx, ke = jax.random.split(key, 3)
    x = jax.random.normal(kx, (num_nodes, input_dim), jnp.float32)
    edge_index = jax.random.randint(ke, (2, num_edges), 0, num_nodes, jnp.int32)

    params = init_params(key, input_dim, output_dim, hidden_dim)

    out = gin_classifier_7_layer(x, edge_index, params)
    out = jax.block_until_ready(out)
    assert out.shape == (num_nodes, output_dim), out.shape
    assert bool(jnp.all(jnp.isfinite(out)))

    ref = jax.block_until_ready(_reference(x, edge_index, params))
    max_err = float(jnp.max(jnp.abs(out - ref)))
    scale = float(jnp.max(jnp.abs(ref))) + 1.0
    assert max_err <= 1e-3 * scale, (
        f"max abs error vs reference: {max_err} (scale {scale})")

    print("KERNEL_OK")
</pallas_src>

<mosaic_0001>
module attributes {stable_mosaic.version = 11 : i64} {
  func.func @_gin7_fused_kernel(%arg0: memref<128x128xf32, #tpu.memory_space<vmem>>, %arg1: memref<128x128xf32, #tpu.memory_space<vmem>>, %arg2: memref<128x128xf32, #tpu.memory_space<vmem>>, %arg3: memref<128x128xf32, #tpu.memory_space<vmem>>, %arg4: memref<128x128xf32, #tpu.memory_space<vmem>>, %arg5: memref<128x128xf32, #tpu.memory_space<vmem>>, %arg6: memref<128x128xf32, #tpu.memory_space<vmem>>, %arg7: memref<128x128xf32, #tpu.memory_space<vmem>>, %arg8: memref<128x128xf32, #tpu.memory_space<vmem>>, %arg9: memref<1x128xf32, #tpu.memory_space<vmem>>, %arg10: memref<1x128xf32, #tpu.memory_space<vmem>>, %arg11: memref<1x128xf32, #tpu.memory_space<vmem>>, %arg12: memref<1x128xf32, #tpu.memory_space<vmem>>, %arg13: memref<1x128xf32, #tpu.memory_space<vmem>>, %arg14: memref<1x128xf32, #tpu.memory_space<vmem>>, %arg15: memref<1x128xf32, #tpu.memory_space<vmem>>, %arg16: memref<128x128xf32, #tpu.memory_space<vmem>>) attributes {dimension_semantics = [], scalar_prefetch = 0 : i64, scratch_operands = 0 : i64, tpu.core_type = #tpu.core_type<tc>} {
    %c0 = arith.constant 0 : index
    %c0_0 = arith.constant 0 : index
    %0 = vector.load %arg0[%c0, %c0_0] : memref<128x128xf32, #tpu.memory_space<vmem>>, vector<128x128xf32>
    %c0_1 = arith.constant 0 : index
    %c0_2 = arith.constant 0 : index
    %1 = vector.load %arg1[%c0_1, %c0_2] : memref<128x128xf32, #tpu.memory_space<vmem>>, vector<128x128xf32>
    %c0_3 = arith.constant 0 : index
    %c0_4 = arith.constant 0 : index
    %2 = vector.load %arg2[%c0_3, %c0_4] : memref<128x128xf32, #tpu.memory_space<vmem>>, vector<128x128xf32>
    %c0_5 = arith.constant 0 : index
    %c0_6 = arith.constant 0 : index
    %3 = vector.load %arg9[%c0_5, %c0_6] : memref<1x128xf32, #tpu.memory_space<vmem>>, vector<1x128xf32>
    %cst = arith.constant dense<0.000000e+00> : vector<128x128xf32>
    %4 = tpu.matmul %0, %1, %cst {dimension_numbers = #tpu.dot_dimension_numbers<[1], [0], [0], [1], [0, 0, 1, 1], [], []>} : vector<128x128xf32>, vector<128x128xf32>, vector<128x128xf32> -> vector<128x128xf32>
    %cst_7 = arith.constant dense<0.000000e+00> : vector<128x128xf32>
    %5 = tpu.matmul %4, %2, %cst_7 {dimension_numbers = #tpu.dot_dimension_numbers<[1], [0], [0], [1], [0, 0, 1, 1], [], []>} : vector<128x128xf32>, vector<128x128xf32>, vector<128x128xf32> -> vector<128x128xf32>
    %6 = vector.broadcast %3 : vector<1x128xf32> to vector<128x128xf32>
    %7 = arith.addf %5, %6 : vector<128x128xf32>
    %cst_8 = arith.constant 0.000000e+00 : f32
    %8 = vector.broadcast %cst_8 : f32 to vector<128x128xf32>
    %9 = arith.maximumf %7, %8 : vector<128x128xf32>
    %c0_9 = arith.constant 0 : index
    %c0_10 = arith.constant 0 : index
    %10 = vector.load %arg3[%c0_9, %c0_10] : memref<128x128xf32, #tpu.memory_space<vmem>>, vector<128x128xf32>
    %c0_11 = arith.constant 0 : index
    %c0_12 = arith.constant 0 : index
    %11 = vector.load %arg10[%c0_11, %c0_12] : memref<1x128xf32, #tpu.memory_space<vmem>>, vector<1x128xf32>
    %cst_13 = arith.constant dense<0.000000e+00> : vector<128x128xf32>
    %12 = tpu.matmul %0, %9, %cst_13 {dimension_numbers = #tpu.dot_dimension_numbers<[1], [0], [0], [1], [0, 0, 1, 1], [], []>} : vector<128x128xf32>, vector<128x128xf32>, vector<128x128xf32> -> vector<128x128xf32>
    %cst_14 = arith.constant dense<0.000000e+00> : vector<128x128xf32>
    %13 = tpu.matmul %12, %10, %cst_14 {dimension_numbers = #tpu.dot_dimension_numbers<[1], [0], [0], [1], [0, 0, 1, 1], [], []>} : vector<128x128xf32>, vector<128x128xf32>, vector<128x128xf32> -> vector<128x128xf32>
    %14 = vector.broadcast %11 : vector<1x128xf32> to vector<128x128xf32>
    %15 = arith.addf %13, %14 : vector<128x128xf32>
    %cst_15 = arith.constant 0.000000e+00 : f32
    %16 = vector.broadcast %cst_15 : f32 to vector<128x128xf32>
    %17 = arith.maximumf %15, %16 : vector<128x128xf32>
    %c0_16 = arith.constant 0 : index
    %c0_17 = arith.constant 0 : index
    %18 = vector.load %arg4[%c0_16, %c0_17] : memref<128x128xf32, #tpu.memory_space<vmem>>, vector<128x128xf32>
    %c0_18 = arith.constant 0 : index
    %c0_19 = arith.constant 0 : index
    %19 = vector.load %arg11[%c0_18, %c0_19] : memref<1x128xf32, #tpu.memory_space<vmem>>, vector<1x128xf32>
    %cst_20 = arith.constant dense<0.000000e+00> : vector<128x128xf32>
    %20 = tpu.matmul %0, %17, %cst_20 {dimension_numbers = #tpu.dot_dimension_numbers<[1], [0], [0], [1], [0, 0, 1, 1], [], []>} : vector<128x128xf32>, vector<128x128xf32>, vector<128x128xf32> -> vector<128x128xf32>
    %cst_21 = arith.constant dense<0.000000e+00> : vector<128x128xf32>
    %21 = tpu.matmul %20, %18, %cst_21 {dimension_numbers = #tpu.dot_dimension_numbers<[1], [0], [0], [1], [0, 0, 1, 1], [], []>} : vector<128x128xf32>, vector<128x128xf32>, vector<128x128xf32> -> vector<128x128xf32>
    %22 = vector.broadcast %19 : vector<1x128xf32> to vector<128x128xf32>
    %23 = arith.addf %21, %22 : vector<128x128xf32>
    %cst_22 = arith.constant 0.000000e+00 : f32
    %24 = vector.broadcast %cst_22 : f32 to vector<128x128xf32>
    %25 = arith.maximumf %23, %24 : vector<128x128xf32>
    %c0_23 = arith.constant 0 : index
    %c0_24 = arith.constant 0 : index
    %26 = vector.load %arg5[%c0_23, %c0_24] : memref<128x128xf32, #tpu.memory_space<vmem>>, vector<128x128xf32>
    %c0_25 = arith.constant 0 : index
    %c0_26 = arith.constant 0 : index
    %27 = vector.load %arg12[%c0_25, %c0_26] : memref<1x128xf32, #tpu.memory_space<vmem>>, vector<1x128xf32>
    %cst_27 = arith.constant dense<0.000000e+00> : vector<128x128xf32>
    %28 = tpu.matmul %0, %25, %cst_27 {dimension_numbers = #tpu.dot_dimension_numbers<[1], [0], [0], [1], [0, 0, 1, 1], [], []>} : vector<128x128xf32>, vector<128x128xf32>, vector<128x128xf32> -> vector<128x128xf32>
    %cst_28 = arith.constant dense<0.000000e+00> : vector<128x128xf32>
    %29 = tpu.matmul %28, %26, %cst_28 {dimension_numbers = #tpu.dot_dimension_numbers<[1], [0], [0], [1], [0, 0, 1, 1], [], []>} : vector<128x128xf32>, vector<128x128xf32>, vector<128x128xf32> -> vector<128x128xf32>
    %30 = vector.broadcast %27 : vector<1x128xf32> to vector<128x128xf32>
    %31 = arith.addf %29, %30 : vector<128x128xf32>
    %cst_29 = arith.constant 0.000000e+00 : f32
    %32 = vector.broadcast %cst_29 : f32 to vector<128x128xf32>
    %33 = arith.maximumf %31, %32 : vector<128x128xf32>
    %c0_30 = arith.constant 0 : index
    %c0_31 = arith.constant 0 : index
    %34 = vector.load %arg6[%c0_30, %c0_31] : memref<128x128xf32, #tpu.memory_space<vmem>>, vector<128x128xf32>
    %c0_32 = arith.constant 0 : index
    %c0_33 = arith.constant 0 : index
    %35 = vector.load %arg13[%c0_32, %c0_33] : memref<1x128xf32, #tpu.memory_space<vmem>>, vector<1x128xf32>
    %cst_34 = arith.constant dense<0.000000e+00> : vector<128x128xf32>
    %36 = tpu.matmul %0, %33, %cst_34 {dimension_numbers = #tpu.dot_dimension_numbers<[1], [0], [0], [1], [0, 0, 1, 1], [], []>} : vector<128x128xf32>, vector<128x128xf32>, vector<128x128xf32> -> vector<128x128xf32>
    %cst_35 = arith.constant dense<0.000000e+00> : vector<128x128xf32>
    %37 = tpu.matmul %36, %34, %cst_35 {dimension_numbers = #tpu.dot_dimension_numbers<[1], [0], [0], [1], [0, 0, 1, 1], [], []>} : vector<128x128xf32>, vector<128x128xf32>, vector<128x128xf32> -> vector<128x128xf32>
    %38 = vector.broadcast %35 : vector<1x128xf32> to vector<128x128xf32>
    %39 = arith.addf %37, %38 : vector<128x128xf32>
    %cst_36 = arith.constant 0.000000e+00 : f32
    %40 = vector.broadcast %cst_36 : f32 to vector<128x128xf32>
    %41 = arith.maximumf %39, %40 : vector<128x128xf32>
    %c0_37 = arith.constant 0 : index
    %c0_38 = arith.constant 0 : index
    %42 = vector.load %arg7[%c0_37, %c0_38] : memref<128x128xf32, #tpu.memory_space<vmem>>, vector<128x128xf32>
    %c0_39 = arith.constant 0 : index
    %c0_40 = arith.constant 0 : index
    %43 = vector.load %arg14[%c0_39, %c0_40] : memref<1x128xf32, #tpu.memory_space<vmem>>, vector<1x128xf32>
    %cst_41 = arith.constant dense<0.000000e+00> : vector<128x128xf32>
    %44 = tpu.matmul %0, %41, %cst_41 {dimension_numbers = #tpu.dot_dimension_numbers<[1], [0], [0], [1], [0, 0, 1, 1], [], []>} : vector<128x128xf32>, vector<128x128xf32>, vector<128x128xf32> -> vector<128x128xf32>
    %cst_42 = arith.constant dense<0.000000e+00> : vector<128x128xf32>
    %45 = tpu.matmul %44, %42, %cst_42 {dimension_numbers = #tpu.dot_dimension_numbers<[1], [0], [0], [1], [0, 0, 1, 1], [], []>} : vector<128x128xf32>, vector<128x128xf32>, vector<128x128xf32> -> vector<128x128xf32>
    %46 = vector.broadcast %43 : vector<1x128xf32> to vector<128x128xf32>
    %47 = arith.addf %45, %46 : vector<128x128xf32>
    %cst_43 = arith.constant 0.000000e+00 : f32
    %48 = vector.broadcast %cst_43 : f32 to vector<128x128xf32>
    %49 = arith.maximumf %47, %48 : vector<128x128xf32>
    %c0_44 = arith.constant 0 : index
    %c0_45 = arith.constant 0 : index
    %50 = vector.load %arg8[%c0_44, %c0_45] : memref<128x128xf32, #tpu.memory_space<vmem>>, vector<128x128xf32>
    %c0_46 = arith.constant 0 : index
    %c0_47 = arith.constant 0 : index
    %51 = vector.load %arg15[%c0_46, %c0_47] : memref<1x128xf32, #tpu.memory_space<vmem>>, vector<1x128xf32>
    %cst_48 = arith.constant dense<0.000000e+00> : vector<128x128xf32>
    %52 = tpu.matmul %49, %50, %cst_48 {dimension_numbers = #tpu.dot_dimension_numbers<[1], [0], [0], [1], [0, 0, 1, 1], [], []>} : vector<128x128xf32>, vector<128x128xf32>, vector<128x128xf32> -> vector<128x128xf32>
    %cst_49 = arith.constant dense<0.000000e+00> : vector<128x128xf32>
    %53 = tpu.matmul %0, %52, %cst_49 {dimension_numbers = #tpu.dot_dimension_numbers<[1], [0], [0], [1], [0, 0, 1, 1], [], []>} : vector<128x128xf32>, vector<128x128xf32>, vector<128x128xf32> -> vector<128x128xf32>
    %54 = vector.broadcast %51 : vector<1x128xf32> to vector<128x128xf32>
    %55 = arith.addf %53, %54 : vector<128x128xf32>
    %c0_50 = arith.constant 0 : index
    %c0_51 = arith.constant 0 : index
    %56 = vector.load %arg16[%c0_50, %c0_51] : memref<128x128xf32, #tpu.memory_space<vmem>>, vector<128x128xf32>
    tpu.vector_store %arg16[%c0_50, %c0_51], %55 {strides = array<i32>} : memref<128x128xf32, #tpu.memory_space<vmem>>, vector<128x128xf32>,
    return
  }
}

</mosaic_0001>

<bundles_post_ra>
// kernel: tpu_custom_call.1
= control target key start
LH: loop header
LB: loop body
LE: loop exit
PB: predicated region body
PF: predicated region fallthrough
CT: control target
= control target key end

     0   :  { %s5041_s0 = inlined_call_operand.hbm [shape: f32[128,128], index: 0, kind: input, shape index: {}]   ;;  %s5042_s1 = inlined_call_operand.hbm [shape: f32[128,128], index: 1, kind: input, shape index: {}]   ;;  %s5043_s2 = inlined_call_operand.hbm [shape: f32[128,128], index: 2, kind: input, shape index: {}]   ;;  %s5044_s3 = inlined_call_operand.hbm [shape: f32[128,128], index: 3, kind: input, shape index: {}]   ;;  %s5045_s4 = inlined_call_operand.hbm [shape: f32[128,128], index: 4, kind: input, shape index: {}]   ;;  %s5046_s5 = inlined_call_operand.hbm [shape: f32[128,128], index: 5, kind: input, shape index: {}]   ;;  %s5047_s6 = inlined_call_operand.hbm [shape: f32[128,128], index: 6, kind: input, shape index: {}]   ;;  %s5048_s7 = inlined_call_operand.hbm [shape: f32[128,128], index: 7, kind: input, shape index: {}]   ;;  %s5049_s8 = inlined_call_operand.hbm [shape: f32[128,128], index: 8, kind: input, shape index: {}]   ;;  %s5050_s9 = inlined_call_operand.vmem [shape: f32[1,128], index: 9, kind: input, shape index: {}]   ;;  %s5051_s10 = inlined_call_operand.vmem [shape: f32[1,128], index: 10, kind: input, shape index: {}]   ;;  %s5052_s11 = inlined_call_operand.vmem [shape: f32[1,128], index: 11, kind: input, shape index: {}]   ;;  %s5053_s12 = inlined_call_operand.vmem [shape: f32[1,128], index: 12, kind: input, shape index: {}]   ;;  %s5054_s13 = inlined_call_operand.vmem [shape: f32[1,128], index: 13, kind: input, shape index: {}]   ;;  %s5055_s14 = inlined_call_operand.vmem [shape: f32[1,128], index: 14, kind: input, shape index: {}]   ;;  %s5056_s15 = inlined_call_operand.vmem [shape: f32[1,128], index: 15, kind: input, shape index: {}]   ;;  %s5057_s16 = inlined_call_operand.hbm [shape: f32[128,128], index: 16, kind: output, shape index: {}]  }
   0x1   :  { %5059 = sst [smem:[#allocation24_spill]] %s5041_s0 }
   0x2   :  { %21 = vsyncpa [#allocation3], 0 }
   0x3   :  { %22 = vsyncpa [#allocation6], 0 }
   0x4   :  { %23 = vsyncpa [#allocation9], 0 }
   0x5   :  { %24 = vsyncpa [#allocation12], 0 }
   0x6   :  { %25 = vsyncpa [#allocation15], 0 }
   0x7   :  { %26 = vsyncpa [#allocation4], 0  ;;  %s4479_s21 = smov [#allocation5]   ;;  %s4480_s23 = smov [#allocation8]  }
   0x8   :  { %s44_s22 = sshll.u32 %s4479_s21, 4  ;;  %s68_s24 = sshll.u32 %s4480_s23, 4  ;;  %s45_s22 = int_to_ptr.vmem [resolvable:$true] %s44_s22  ;;  %s4576_s24 = int_to_ptr.vmem [resolvable:$true] %s68_s24 }
   0x9   :  { %s4247_s27 = scalar_lea.hbm %s5042_s1, 2048 }
   0xa   :  { %p4248_p0 = scmp.ne.s32.totalorder %s5042_s1, %s4247_s27  ;;  %p4251_p1 = scmp.lt.u32.totalorder %s4247_s27, %s5042_s1 }
   0xc   :  { %p4253_p2 = pnand %p4251_p1, %p4248_p0 }
   0xe   :  { %4256 = shalt.err (!%p4253_p2)
}
   0xf   :  { %s4257_s17 = scalar_lea.vmem %s45_s22, 2048  ;;  %p4262_p4 = scmp.lt.s32.totalorder %s45_s22, %s45_s22 }
  0x10   :  { %p4258_p3 = scmp.ne.s32.totalorder %s45_s22, %s4257_s17  ;;  %p4263_p5 = scmp.lt.s32.totalorder %s4257_s17, %s4257_s17 }
  0x12   :  { %p4264_p6 = por %p4263_p5, %p4262_p4 }
  0x14   :  { %p4265_p7 = pnand %p4264_p6, %p4258_p3 }
  0x16   :  { %4268 = shalt.err (!%p4265_p7)
}
  0x17   :  { %s4481_s18 = smov 128   ;;  %s4482_s19 = smov 8  }
  0x18   :  { %50 = dma.hbm_to_vmem [thread:$0]  %s5042_s1, 2048, %s45_s22, [#allocation6], %s4481_s18, %s4481_s18, %s4482_s19  }
  0x19   :  { %s4269_s26 = scalar_lea.hbm %s5044_s3, 2048 }
  0x1a   :  { %p4270_p8 = scmp.ne.s32.totalorder %s5044_s3, %s4269_s26  ;;  %p4273_p9 = scmp.lt.u32.totalorder %s4269_s26, %s5044_s3 }
  0x1c   :  { %p4275_p10 = pnand %p4273_p9, %p4270_p8 }
  0x1e   :  { %4278 = shalt.err (!%p4275_p10)
}
  0x1f   :  { %s4279_s0 = scalar_lea.vmem %s4576_s24, 2048  ;;  %p4284_p12 = scmp.lt.s32.totalorder %s4576_s24, %s4576_s24 }
  0x20   :  { %p4280_p11 = scmp.ne.s32.totalorder %s4576_s24, %s4279_s0  ;;  %p4285_p13 = scmp.lt.s32.totalorder %s4279_s0, %s4279_s0 }
  0x22   :  { %p4286_p0 = por %p4285_p13, %p4284_p12 }
  0x24   :  { %p4287_p1 = pnand %p4286_p0, %p4280_p11 }
  0x26   :  { %4290 = shalt.err (!%p4287_p1)
}
  0x27   :  { %74 = dma.hbm_to_vmem [thread:$0]  %s5044_s3, 2048, %s4576_s24, [#allocation9], %s4481_s18, %s4481_s18, %s4482_s19  }
  0x28   :  { %s4483_s17 = smov [#allocation11]   ;;  %s4484_s21 = smov [#allocation14]  }
  0x29   :  { %s92_s20 = sshll.u32 %s4483_s17, 4  ;;  %s116_s23 = sshll.u32 %s4484_s21, 4  ;;  %s93_s20 = int_to_ptr.vmem [resolvable:$true] %s92_s20  ;;  %s4613_s23 = int_to_ptr.vmem [resolvable:$true] %s116_s23 }
  0x2a   :  { %s4291_s27 = scalar_lea.hbm %s5046_s5, 2048 }
  0x2b   :  { %p4292_p2 = scmp.ne.s32.totalorder %s5046_s5, %s4291_s27  ;;  %p4295_p3 = scmp.lt.u32.totalorder %s4291_s27, %s5046_s5 }
  0x2d   :  { %p4297_p4 = pnand %p4295_p3, %p4292_p2 }
  0x2f   :  { %4300 = shalt.err (!%p4297_p4)
}
  0x30   :  { %s4301_s3 = scalar_lea.vmem %s93_s20, 2048  ;;  %p4306_p6 = scmp.lt.s32.totalorder %s93_s20, %s93_s20 }
  0x31   :  { %p4302_p5 = scmp.ne.s32.totalorder %s93_s20, %s4301_s3  ;;  %p4307_p7 = scmp.lt.s32.totalorder %s4301_s3, %s4301_s3 }
  0x33   :  { %p4308_p8 = por %p4307_p7, %p4306_p6 }
  0x35   :  { %p4309_p9 = pnand %p4308_p8, %p4302_p5 }
  0x37   :  { %4312 = shalt.err (!%p4309_p9)
}
  0x38   :  { %98 = dma.hbm_to_vmem [thread:$0]  %s5046_s5, 2048, %s93_s20, [#allocation12], %s4481_s18, %s4481_s18, %s4482_s19  }
  0x39   :  { %s4313_s21 = scalar_lea.hbm %s5048_s7, 2048 }
  0x3a   :  { %p4314_p10 = scmp.ne.s32.totalorder %s5048_s7, %s4313_s21  ;;  %p4317_p11 = scmp.lt.u32.totalorder %s4313_s21, %s5048_s7 }
  0x3c   :  { %p4319_p12 = pnand %p4317_p11, %p4314_p10 }
  0x3e   :  { %4322 = shalt.err (!%p4319_p12)
}
  0x3f   :  { %s4323_s29 = scalar_lea.vmem %s4613_s23, 2048  ;;  %p4328_p0 = scmp.lt.s32.totalorder %s4613_s23, %s4613_s23 }
  0x40   :  { %p4324_p13 = scmp.ne.s32.totalorder %s4613_s23, %s4323_s29  ;;  %p4329_p1 = scmp.lt.s32.totalorder %s4323_s29, %s4323_s29 }
  0x42   :  { %p4330_p2 = por %p4329_p1, %p4328_p0 }
  0x44   :  { %p4331_p3 = pnand %p4330_p2, %p4324_p13 }
  0x46   :  { %4334 = shalt.err (!%p4331_p3)
}
  0x47   :  { %122 = dma.hbm_to_vmem [thread:$0]  %s5048_s7, 2048, %s4613_s23, [#allocation15], %s4481_s18, %s4481_s18, %s4482_s19  }
  0x48   :  { %s4485_s30 = smov [#allocation2]   ;;  %s4486_s3 = smov [#allocation7]  }
  0x49   :  { %s32_s0 = sshll.u32 %s4485_s30, 4  ;;  %s56_s24 = sshll.u32 %s4486_s3, 4  ;;  %s33_s0 = int_to_ptr.vmem [resolvable:$true] %s32_s0  ;;  %s4650_s24 = int_to_ptr.vmem [resolvable:$true] %s56_s24 }
  0x4a   :  { %s5060_s17 = sld [smem:[#allocation24_spill]] }
  0x50   :  { %s4335_s21 = scalar_lea.hbm %s5060_s17, 2048 }
  0x51   :  { %p4336_p4 = scmp.ne.s32.totalorder %s5060_s17, %s4335_s21  ;;  %p4339_p5 = scmp.lt.u32.totalorder %s4335_s21, %s5060_s17 }
  0x53   :  { %p4341_p6 = pnand %p4339_p5, %p4336_p4 }
  0x55   :  { %4344 = shalt.err (!%p4341_p6)
}
  0x56   :  { %s4345_s7 = scalar_lea.vmem %s33_s0, 2048  ;;  %p4350_p8 = scmp.lt.s32.totalorder %s33_s0, %s33_s0 }
  0x57   :  { %p4346_p7 = scmp.ne.s32.totalorder %s33_s0, %s4345_s7  ;;  %p4351_p9 = scmp.lt.s32.totalorder %s4345_s7, %s4345_s7 }
  0x59   :  { %p4352_p10 = por %p4351_p9, %p4350_p8 }
  0x5b   :  { %p4353_p11 = pnand %p4352_p10, %p4346_p7 }
  0x5d   :  { %4356 = shalt.err (!%p4353_p11)
}
  0x5e   :  { %38 = dma.hbm_to_vmem [thread:$0]  %s5060_s17, 2048, %s33_s0, [#allocation3], %s4481_s18, %s4481_s18, %s4482_s19  }
  0x5f   :  { %s4357_s30 = scalar_lea.hbm %s5043_s2, 2048 }
  0x60   :  { %p4358_p12 = scmp.ne.s32.totalorder %s5043_s2, %s4357_s30  ;;  %p4361_p13 = scmp.lt.u32.totalorder %s4357_s30, %s5043_s2 }
  0x62   :  { %p4363_p0 = pnand %p4361_p13, %p4358_p12 }
  0x64   :  { %4366 = shalt.err (!%p4363_p0)
}
  0x65   :  { %s4367_s25 = scalar_lea.vmem %s4650_s24, 2048  ;;  %p4372_p2 = scmp.lt.s32.totalorder %s4650_s24, %s4650_s24 }
  0x66   :  { %p4368_p1 = scmp.ne.s32.totalorder %s4650_s24, %s4367_s25  ;;  %p4373_p3 = scmp.lt.s32.totalorder %s4367_s25, %s4367_s25 }
  0x68   :  { %p4374_p4 = por %p4373_p3, %p4372_p2 }
  0x6a   :  { %p4375_p5 = pnand %p4374_p4, %p4368_p1 }
  0x6c   :  { %4378 = shalt.err (!%p4375_p5)
}
  0x6d   :  { %62 = dma.hbm_to_vmem [thread:$0]  %s5043_s2, 2048, %s4650_s24, [#allocation6], %s4481_s18, %s4481_s18, %s4482_s19  }
  0x6e   :  { %s4487_s26 = smov [#allocation10]   ;;  %s4488_s28 = smov [#allocation13]  }
  0x6f   :  { %s80_s27 = sshll.u32 %s4487_s26, 4  ;;  %s104_s7 = sshll.u32 %s4488_s28, 4  ;;  %s81_s27 = int_to_ptr.vmem [resolvable:$true] %s80_s27  ;;  %s4687_s7 = int_to_ptr.vmem [resolvable:$true] %s104_s7 }
  0x70   :  { %s4379_s5 = scalar_lea.hbm %s5045_s4, 2048 }
  0x71   :  { %p4380_p6 = scmp.ne.s32.totalorder %s5045_s4, %s4379_s5  ;;  %p4383_p7 = scmp.lt.u32.totalorder %s4379_s5, %s5045_s4 }
  0x73   :  { %p4385_p8 = pnand %p4383_p7, %p4380_p6 }
  0x75   :  { %4388 = shalt.err (!%p4385_p8)
}
  0x76   :  { %s4389_s2 = scalar_lea.vmem %s81_s27, 2048  ;;  %p4394_p10 = scmp.lt.s32.totalorder %s81_s27, %s81_s27 }
  0x77   :  { %p4390_p9 = scmp.ne.s32.totalorder %s81_s27, %s4389_s2  ;;  %p4395_p11 = scmp.lt.s32.totalorder %s4389_s2, %s4389_s2 }
  0x79   :  { %p4396_p12 = por %p4395_p11, %p4394_p10 }
  0x7b   :  { %p4397_p13 = pnand %p4396_p12, %p4390_p9 }
  0x7d   :  { %4400 = shalt.err (!%p4397_p13)
}
  0x7e   :  { %86 = dma.hbm_to_vmem [thread:$0]  %s5045_s4, 2048, %s81_s27, [#allocation9], %s4481_s18, %s4481_s18, %s4482_s19  }
  0x7f   :  { %s4401_s0 = scalar_lea.hbm %s5047_s6, 2048 }
  0x80   :  { %p4402_p0 = scmp.ne.s32.totalorder %s5047_s6, %s4401_s0  ;;  %p4405_p1 = scmp.lt.u32.totalorder %s4401_s0, %s5047_s6 }
  0x82   :  { %p4407_p2 = pnand %p4405_p1, %p4402_p0 }
  0x84   :  { %4410 = shalt.err (!%p4407_p2)
}
  0x85   :  { %s4411_s29 = scalar_lea.vmem %s4687_s7, 2048  ;;  %p4416_p4 = scmp.lt.s32.totalorder %s4687_s7, %s4687_s7 }
  0x86   :  { %p4412_p3 = scmp.ne.s32.totalorder %s4687_s7, %s4411_s29  ;;  %p4417_p5 = scmp.lt.s32.totalorder %s4411_s29, %s4411_s29 }
  0x88   :  { %p4418_p6 = por %p4417_p5, %p4416_p4 }
  0x8a   :  { %p4419_p7 = pnand %p4418_p6, %p4412_p3 }
  0x8c   :  { %4422 = shalt.err (!%p4419_p7)
}
  0x8d   :  { %110 = dma.hbm_to_vmem [thread:$0]  %s5047_s6, 2048, %s4687_s7, [#allocation12], %s4481_s18, %s4481_s18, %s4482_s19  }
  0x8e   :  { %s4489_s5 = smov [#allocation16]   ;;  %s4423_s1 = scalar_lea.hbm %s5049_s8, 2048 }
  0x8f   :  { %s128_s20 = sshll.u32 %s4489_s5, 4  ;;  %p4424_p8 = scmp.ne.s32.totalorder %s5049_s8, %s4423_s1  ;;  %s129_s20 = int_to_ptr.vmem [resolvable:$true] %s128_s20 }
  0x90   :  { %p4427_p9 = scmp.lt.u32.totalorder %s4423_s1, %s5049_s8 }
  0x92   :  { %p4429_p10 = pnand %p4427_p9, %p4424_p8 }
  0x94   :  { %4432 = shalt.err (!%p4429_p10)
}
  0x95   :  { %s4433_s25 = scalar_lea.vmem %s129_s20, 2048  ;;  %p4438_p12 = scmp.lt.s32.totalorder %s129_s20, %s129_s20 }
  0x96   :  { %p4434_p11 = scmp.ne.s32.totalorder %s129_s20, %s4433_s25  ;;  %p4439_p13 = scmp.lt.s32.totalorder %s4433_s25, %s4433_s25 }
  0x98   :  { %p4440_p0 = por %p4439_p13, %p4438_p12 }
  0x9a   :  { %p4441_p1 = pnand %p4440_p0, %p4434_p11 }
  0x9c   :  { %4444 = shalt.err (!%p4441_p1)
}
  0x9d   :  { %134 = dma.hbm_to_vmem [thread:$0]  %s5049_s8, 2048, %s129_s20, [#allocation15], %s4481_s18, %s4481_s18, %s4482_s19  }
  0x9e   :  { %4467 = dma.done.wait [#allocation3], 2048  }
  0x9f   :  { %4468 = vsyncadd [#allocation3], 4294965248 }
  0xa0   :  { %4469 = dma.done.wait [#allocation6], 4096  }
  0xa1   :  { %4470 = vsyncadd [#allocation6], 4294963200 }
  0xa2   :  { %4471 = dma.done.wait [#allocation9], 4096  }
  0xa3   :  { %4472 = vsyncadd [#allocation9], 4294963200 }
  0xa4   :  { %4473 = dma.done.wait [#allocation12], 4096  }
  0xa5   :  { %4474 = vsyncadd [#allocation12], 4294963200 }
  0xa6   :  { %4475 = dma.done.wait [#allocation15], 4096  }
  0xa7   :  { %4476 = vsyncadd [#allocation15], 4294963200  ;;  %v192_v0 = vld [vmem:[#allocation5] sm:$0xff]  ;;  %v193_v1 = vld [vmem:[#allocation5 + $0x8] sm:$0xff] }
  0xa8   :  { %v194_v2 = vld [vmem:[#allocation5 + $0x10] sm:$0xff]  ;;  %v3771_v3 = vpack.c.bf16 %v193_v1, %v192_v0  ;;  %v195_v4 = vld [vmem:[#allocation5 + $0x18] sm:$0xff]  ;;  %v196_v6 = vld [vmem:[#allocation5 + $0x20] sm:$0xff] }
  0xa9   :  { %v3775_v5 = vpack.c.bf16 %v195_v4, %v194_v2  ;;  %v197_v7 = vld [vmem:[#allocation5 + $0x28] sm:$0xff]  ;;  %v4739_v9 = vld [vmem:[#allocation2] sm:$0xff]  ;;  %v198_v10 = vld [vmem:[#allocation5 + $0x30] sm:$0xff] }
  0xaa   :  { %3772 = vmatprep.subr.bf16.mxu0 %v3771_v3  ;;  %v3779_v8 = vpack.c.bf16 %v197_v7, %v196_v6  ;;  %v199_v11 = vld [vmem:[#allocation5 + $0x38] sm:$0xff]  ;;  %3019 = vmatprep.mubr.f32.mxu0 %v4739_v9  ;;  %v200_v13 = vld [vmem:[#allocation5 + $0x40] sm:$0xff]  ;;  %v201_v14 = vld [vmem:[#allocation5 + $0x48] sm:$0xff] }
  0xab   :  { %3774 = vmatpush3.bf16.msra.mxu0 %v3771_v3  ;;  %v3783_v12 = vpack.c.bf16 %v199_v11, %v198_v10  ;;  %v208_v15 = vld [vmem:[#allocation7] sm:$0xff]  ;;  %v209_v16 = vld [vmem:[#allocation7 + $0x8] sm:$0xff]  ;;  %v210_v17 = vld [vmem:[#allocation7 + $0x10] sm:$0xff]  ;;  %v3787_v21 = vpack.c.bf16 %v201_v14, %v200_v13 }
  0xac   :  { %3776 = vmatprep.subr.bf16.mxu0 %v3775_v5  ;;  %v211_v18 = vld [vmem:[#allocation7 + $0x18] sm:$0xff]  ;;  %v3803_v19 = vpack.c.bf16 %v209_v16, %v208_v15  ;;  %v212_v22 = vld [vmem:[#allocation7 + $0x20] sm:$0xff]  ;;  %v213_v23 = vld [vmem:[#allocation7 + $0x28] sm:$0xff] }
  0xad   :  { %v3807_v20 = vpack.c.bf16 %v211_v18, %v210_v17  ;;  %v202_v24 = vld [vmem:[#allocation5 + $0x50] sm:$0xff]  ;;  %v203_v25 = vld [vmem:[#allocation5 + $0x58] sm:$0xff]  ;;  %v3811_v26 = vpack.c.bf16 %v213_v23, %v212_v22  ;;  %v204_v30 = vld [vmem:[#allocation5 + $0x60] sm:$0xff] }
  0xae   :  { %3804 = vmatprep.subr.bf16.mxu1 %v3803_v19  ;;  %v3791_v27 = vpack.c.bf16 %v203_v25, %v202_v24  ;;  %v214_v28 = vld [vmem:[#allocation7 + $0x30] sm:$0xff]  ;;  %v215_v29 = vld [vmem:[#allocation7 + $0x38] sm:$0xff]  ;;  %v205_v31 = vld [vmem:[#allocation5 + $0x68] sm:$0xff] }
  0xaf   :  { %3778 = vmatpush3.bf16.msra.mxu0 %v3775_v5  ;;  %3806 = vmatpush3.bf16.msra.mxu1 %v3803_v19  ;;  %v3815_v32 = vpack.c.bf16 %v215_v29, %v214_v28  ;;  %v3795_v33 = vpack.c.bf16 %v205_v31, %v204_v30  ;;  %v216_v34 = vld [vmem:[#allocation7 + $0x40] sm:$0xff]  ;;  %v217_v35 = vld [vmem:[#allocation7 + $0x48] sm:$0xff]  ;;  %v206_v36 = vld [vmem:[#allocation5 + $0x70] sm:$0xff] }
  0xb0   :  { %3780 = vmatprep.subr.bf16.mxu0 %v3779_v8  ;;  %3808 = vmatprep.subr.bf16.mxu1 %v3807_v20  ;;  %v207_v37 = vld [vmem:[#allocation5 + $0x78] sm:$0xff]  ;;  %v3819_v38 = vpack.c.bf16 %v217_v35, %v216_v34  ;;  %v218_v40 = vld [vmem:[#allocation7 + $0x50] sm:$0xff]  ;;  %v220_v43 = vld [vmem:[#allocation7 + $0x60] sm:$0xff] }
  0xb1   :  { %v3799_v39 = vpack.c.bf16 %v207_v37, %v206_v36  ;;  %v219_v41 = vld [vmem:[#allocation7 + $0x58] sm:$0xff]  ;;  %v221_v44 = vld [vmem:[#allocation7 + $0x68] sm:$0xff]  ;;  %v4744_v47 = vld [vmem:[#allocation2 + $0x10] sm:$0xff] }
  0xb2   :  { %v3823_v42 = vpack.c.bf16 %v219_v41, %v218_v40  ;;  %v4742_v45 = vld [vmem:[#allocation2 + $0x8] sm:$0xff]  ;;  %v3827_v46 = vpack.c.bf16 %v221_v44, %v220_v43  ;;  %v222_v48 = vld [vmem:[#allocation7 + $0x70] sm:$0xff]  ;;  %v223_v49 = vld [vmem:[#allocation7 + $0x78] sm:$0xff] }
  0xb3   :  { %3782 = vmatpush3.bf16.msra.mxu0 %v3779_v8  ;;  %3810 = vmatpush3.bf16.msra.mxu1 %v3807_v20  ;;  %v4748_v50 = vld [vmem:[#allocation2 + $0x18] sm:$0xff]  ;;  %v3831_v51 = vpack.c.bf16 %v223_v49, %v222_v48  ;;  %v4750_v52 = vld [vmem:[#allocation2 + $0x20] sm:$0xff]  ;;  %v4754_v53 = vld [vmem:[#allocation2 + $0x28] sm:$0xff] }
  0xb4   :  { %3784 = vmatprep.subr.bf16.mxu0 %v3783_v12  ;;  %3812 = vmatprep.subr.bf16.mxu1 %v3811_v26  ;;  %v4756_v54 = vld [vmem:[#allocation2 + $0x30] sm:$0xff]  ;;  %v4760_v55 = vld [vmem:[#allocation2 + $0x38] sm:$0xff]  ;;  %v4762_v56 = vld [vmem:[#allocation2 + $0x40] sm:$0xff] }
  0xb5   :  { %v4766_v57 = vld [vmem:[#allocation2 + $0x48] sm:$0xff]  ;;  %v4768_v58 = vld [vmem:[#allocation2 + $0x50] sm:$0xff]  ;;  %v4772_v59 = vld [vmem:[#allocation2 + $0x58] sm:$0xff] }
  0xb6   :  { %v4774_v60 = vld [vmem:[#allocation2 + $0x60] sm:$0xff]  ;;  %v4778_v61 = vld [vmem:[#allocation2 + $0x68] sm:$0xff]  ;;  %v4780_v62 = vld [vmem:[#allocation2 + $0x70] sm:$0xff] }
  0xb7   :  { %3786 = vmatpush3.bf16.msra.mxu0 %v3783_v12  ;;  %3814 = vmatpush3.bf16.msra.mxu1 %v3811_v26  ;;  %v4784_v63 = vld [vmem:[#allocation2 + $0x78] sm:$0xff]  ;;  %v537_v17 = vld [vmem:[#allocation8] sm:$0xff]  ;;  %v538_v18 = vld [vmem:[#allocation8 + $0x8] sm:$0xff] }
  0xb8   :  { %3788 = vmatprep.subr.bf16.mxu0 %v3787_v21  ;;  %3816 = vmatprep.subr.bf16.mxu1 %v3815_v32  ;;  %v539_v19 = vld [vmem:[#allocation8 + $0x10] sm:$0xff]  ;;  %v3867_v20 = vpack.c.bf16 %v538_v18, %v537_v17  ;;  %v541_v23 = vld [vmem:[#allocation8 + $0x20] sm:$0xff]  ;;  %v542_v24 = vld [vmem:[#allocation8 + $0x28] sm:$0xff] }
  0xb9   :  { %v3875_v25 = vpack.c.bf16 %v542_v24, %v541_v23  ;;  %v543_v26 = vld [vmem:[#allocation8 + $0x30] sm:$0xff]  ;;  %v545_v29 = vld [vmem:[#allocation8 + $0x40] sm:$0xff]  ;;  %v546_v30 = vld [vmem:[#allocation8 + $0x48] sm:$0xff] }
  0xba   :  { %v3883_v31 = vpack.c.bf16 %v546_v30, %v545_v29  ;;  %v549_v35 = vld [vmem:[#allocation8 + $0x60] sm:$0xff]  ;;  %v550_v36 = vld [vmem:[#allocation8 + $0x68] sm:$0xff] }
  0xbb   :  { %3790 = vmatpush3.bf16.msra.mxu0 %v3787_v21  ;;  %3818 = vmatpush3.bf16.msra.mxu1 %v3815_v32  ;;  %v540_v21 = vld [vmem:[#allocation8 + $0x18] sm:$0xff]  ;;  %v547_v32 = vld [vmem:[#allocation8 + $0x50] sm:$0xff]  ;;  %v3891_v37 = vpack.c.bf16 %v550_v36, %v549_v35  ;;  %v4791_v41 = vld [vmem:[%s5050_s9] ss:$0 sm:$0xff] }
  0xbc   :  { %3792 = vmatprep.subr.bf16.mxu0 %v3791_v27  ;;  %3820 = vmatprep.subr.bf16.mxu1 %v3819_v38  ;;  %v3871_v22 = vpack.c.bf16 %v540_v21, %v539_v19 }
  0xbf   :  { %3794 = vmatpush3.bf16.msra.mxu0 %v3791_v27  ;;  %3822 = vmatpush3.bf16.msra.mxu1 %v3819_v38  ;;  %v544_v27 = vld [vmem:[#allocation8 + $0x38] sm:$0xff]  ;;  %v551_v38 = vld [vmem:[#allocation8 + $0x70] sm:$0xff] }
  0xc0   :  { %3796 = vmatprep.subr.bf16.mxu0 %v3795_v33  ;;  %3824 = vmatprep.subr.bf16.mxu1 %v3823_v42  ;;  %v3879_v28 = vpack.c.bf16 %v544_v27, %v543_v26 }
  0xc3   :  { %3798 = vmatpush3.bf16.msra.mxu0 %v3795_v33  ;;  %3826 = vmatpush3.bf16.msra.mxu1 %v3823_v42  ;;  %v548_v33 = vld [vmem:[#allocation8 + $0x58] sm:$0xff] }
  0xc4   :  { %3800 = vmatprep.subr.bf16.mxu0 %v3799_v39  ;;  %3828 = vmatprep.subr.bf16.mxu1 %v3827_v46  ;;  %v3887_v34 = vpack.c.bf16 %v548_v33, %v547_v32 }
  0xc7   :  { %3802 = vmatpush3.bf16.msra.mxu0 %v3799_v39  ;;  %3830 = vmatpush3.bf16.msra.mxu1 %v3827_v46  ;;  %v552_v39 = vld [vmem:[#allocation8 + $0x78] sm:$0xff] }
  0xc8   :  { %3832 = vmatprep.subr.bf16.mxu1 %v3831_v51  ;;  %v3895_v40 = vpack.c.bf16 %v552_v39, %v551_v38 }
  0xca   :  { %3020 = vmatmul.mubr.f32.vlgmr.msra.gmra.mrb[0].mxu0 %v4742_v45 }
  0xcb   :  { %3022 = vmatprep.mubr.f32.mxu0 %v4744_v47  ;;  %3834 = vmatpush3.bf16.msra.mxu1 %v3831_v51 }
  0xcc   :  { %3868 = vmatprep.subr.bf16.mxu1 %v3867_v20 }
  0xce   :  { %3023 = vmatmul.mubr.f32.gmra.mrb[2].mxu0 %v4748_v50 }
  0xcf   :  { %3025 = vmatprep.mubr.f32.mxu0 %v4750_v52 }
  0xd2   :  { %3026 = vmatmul.mubr.f32.gmra.mrb[4].mxu0 %v4754_v53 }
  0xd3   :  { %3028 = vmatprep.mubr.f32.mxu0 %v4756_v54 }
  0xd6   :  { %3029 = vmatmul.mubr.f32.gmra.mrb[6].mxu0 %v4760_v55 }
  0xd7   :  { %3031 = vmatprep.mubr.f32.mxu0 %v4762_v56 }
  0xda   :  { %3032 = vmatmul.mubr.f32.gmra.mrb[8].mxu0 %v4766_v57 }
  0xdb   :  { %3034 = vmatprep.mubr.f32.mxu0 %v4768_v58 }
  0xde   :  { %3035 = vmatmul.mubr.f32.gmra.mrb[10].mxu0 %v4772_v59 }
  0xdf   :  { %3037 = vmatprep.mubr.f32.mxu0 %v4774_v60 }
  0xe2   :  { %3038 = vmatmul.mubr.f32.gmra.mrb[12].mxu0 %v4778_v61 }
  0xe3   :  { %3040 = vmatprep.mubr.f32.mxu0 %v4780_v62 }
  0xe6   :  { %3041 = vmatmul.mubr.f32.gmra.mrb[14].mxu0 %v4784_v63 }
  0xe7   :  { %3131 = vmatprep.mubr.f32.mxu0 %v4739_v9 }
 0x19d   :  { %v3021_v0 = vpop.f32.mrb[0].mxu0 }
 0x19e   :  { %v291_v1 = vpop.f32.mrb[1].mxu0 }
 0x19f   :  { %3075 = vmatprep.mubr.f32.mxu1 %v291_v1 }
 0x1a0   :  { %3076 = vmatmul.mubr.f32.vlgmr.msra.gmra.mrb[0].mxu1 %v3021_v0 }
 0x1a1   :  { %v3024_v2 = vpop.f32.mrb[2].mxu0  ;;  %3870 = vmatpush3.bf16.msra.mxu1 %v3867_v20 }
 0x1a2   :  { %v301_v3 = vpop.f32.mrb[3].mxu0  ;;  %3872 = vmatprep.subr.bf16.mxu1 %v3871_v22 }
 0x1a3   :  { %3078 = vmatprep.mubr.f32.mxu1 %v301_v3 }
 0x1a4   :  { %3079 = vmatmul.mubr.f32.gmra.mrb[2].mxu1 %v3024_v2 }
 0x1a5   :  { %v3027_v4 = vpop.f32.mrb[4].mxu0  ;;  %3874 = vmatpush3.bf16.msra.mxu1 %v3871_v22 }
 0x1a6   :  { %v311_v5 = vpop.f32.mrb[5].mxu0  ;;  %3876 = vmatprep.subr.bf16.mxu1 %v3875_v25 }
 0x1a7   :  { %3081 = vmatprep.mubr.f32.mxu1 %v311_v5 }
 0x1a8   :  { %3082 = vmatmul.mubr.f32.gmra.mrb[4].mxu1 %v3027_v4 }
 0x1a9   :  { %v3030_v6 = vpop.f32.mrb[6].mxu0  ;;  %3878 = vmatpush3.bf16.msra.mxu1 %v3875_v25 }
 0x1aa   :  { %v321_v7 = vpop.f32.mrb[7].mxu0  ;;  %3880 = vmatprep.subr.bf16.mxu1 %v3879_v28 }
 0x1ab   :  { %3084 = vmatprep.mubr.f32.mxu1 %v321_v7 }
 0x1ac   :  { %3085 = vmatmul.mubr.f32.gmra.mrb[6].mxu1 %v3030_v6 }
 0x1ad   :  { %v3033_v8 = vpop.f32.mrb[8].mxu0  ;;  %3882 = vmatpush3.bf16.msra.mxu1 %v3879_v28 }
 0x1ae   :  { %v331_v10 = vpop.f32.mrb[9].mxu0  ;;  %3884 = vmatprep.subr.bf16.mxu1 %v3883_v31 }
 0x1af   :  { %3087 = vmatprep.mubr.f32.mxu1 %v331_v10 }
 0x1b0   :  { %3088 = vmatmul.mubr.f32.gmra.mrb[8].mxu1 %v3033_v8 }
 0x1b1   :  { %v3036_v11 = vpop.f32.mrb[10].mxu0  ;;  %3886 = vmatpush3.bf16.msra.mxu1 %v3883_v31 }
 0x1b2   :  { %v341_v12 = vpop.f32.mrb[11].mxu0  ;;  %3888 = vmatprep.subr.bf16.mxu1 %v3887_v34 }
 0x1b3   :  { %3090 = vmatprep.mubr.f32.mxu1 %v341_v12 }
 0x1b4   :  { %3091 = vmatmul.mubr.f32.gmra.mrb[10].mxu1 %v3036_v11 }
 0x1b5   :  { %v3039_v13 = vpop.f32.mrb[12].mxu0  ;;  %3890 = vmatpush3.bf16.msra.mxu1 %v3887_v34 }
 0x1b6   :  { %v351_v14 = vpop.f32.mrb[13].mxu0  ;;  %3892 = vmatprep.subr.bf16.mxu1 %v3891_v37 }
 0x1b7   :  { %3093 = vmatprep.mubr.f32.mxu1 %v351_v14 }
 0x1b8   :  { %3094 = vmatmul.mubr.f32.gmra.mrb[12].mxu1 %v3039_v13 }
 0x1b9   :  { %v3042_v15 = vpop.f32.mrb[14].mxu0  ;;  %3894 = vmatpush3.bf16.msra.mxu1 %v3891_v37 }
 0x1ba   :  { %v361_v16 = vpop.f32.mrb[15].mxu0  ;;  %3896 = vmatprep.subr.bf16.mxu1 %v3895_v40 }
 0x1bb   :  { %3096 = vmatprep.mubr.f32.mxu1 %v361_v16 }
 0x1bc   :  { %3097 = vmatmul.mubr.f32.gmra.mrb[14].mxu1 %v3042_v15 }
 0x1bd   :  { %3898 = vmatpush3.bf16.msra.mxu1 %v3895_v40 }
 0x273   :  { %v3077_v42 = vpop.f32.mrb[0].mxu1 }
 0x274   :  { %v448_v43 = vadd.f32 %v3077_v42, %v4791_v41  ;;  %v442_v44 = vpop.f32.mrb[1].mxu1 }
 0x275   :  { %v443_v46 = vadd.f32 %v4791_v41, %v442_v44 }
 0x276   :  { %v522_v48 = vmax.f32 %v448_v43, 0.0 }
 0x277   :  { %v521_v49 = vmax.f32 %v443_v46, 0.0  ;;  %v3080_v51 = vpop.f32.mrb[2].mxu1 }
 0x278   :  { %v458_v0 = vadd.f32 %v3080_v51, %v4791_v41  ;;  %v452_v1 = vpop.f32.mrb[3].mxu1 }
 0x279   :  { %v3835_v2 = vpack.c.bf16 %v522_v48, %v521_v49  ;;  %v453_v3 = vadd.f32 %v4791_v41, %v452_v1 }
 0x27a   :  { %v524_v4 = vmax.f32 %v458_v0, 0.0 }
 0x27b   :  { %v523_v5 = vmax.f32 %v453_v3, 0.0  ;;  %v3083_v6 = vpop.f32.mrb[4].mxu1  ;;  %3836 = vmatprep.subr.bf16.mxu0 %v3835_v2 }
 0x27c   :  { %v468_v7 = vadd.f32 %v3083_v6, %v4791_v41  ;;  %v462_v8 = vpop.f32.mrb[5].mxu1  ;;  %3838 = vmatpush3.bf16.msra.mxu0 %v3835_v2 }
 0x27d   :  { %v3839_v10 = vpack.c.bf16 %v524_v4, %v523_v5  ;;  %v463_v11 = vadd.f32 %v4791_v41, %v462_v8 }
 0x27e   :  { %v526_v12 = vmax.f32 %v468_v7, 0.0 }
 0x27f   :  { %v525_v13 = vmax.f32 %v463_v11, 0.0  ;;  %v3086_v14 = vpop.f32.mrb[6].mxu1  ;;  %3840 = vmatprep.subr.bf16.mxu0 %v3839_v10 }
 0x280   :  { %v478_v15 = vadd.f32 %v3086_v14, %v4791_v41  ;;  %v472_v16 = vpop.f32.mrb[7].mxu1  ;;  %3842 = vmatpush3.bf16.msra.mxu0 %v3839_v10 }
 0x281   :  { %v3843_v17 = vpack.c.bf16 %v526_v12, %v525_v13  ;;  %v473_v18 = vadd.f32 %v4791_v41, %v472_v16 }
 0x282   :  { %v528_v19 = vmax.f32 %v478_v15, 0.0 }
 0x283   :  { %v527_v20 = vmax.f32 %v473_v18, 0.0  ;;  %v3089_v21 = vpop.f32.mrb[8].mxu1  ;;  %3844 = vmatprep.subr.bf16.mxu0 %v3843_v17  ;;  %v866_v18 = vld [vmem:[#allocation10] sm:$0xff] }
 0x284   :  { %v488_v22 = vadd.f32 %v3089_v21, %v4791_v41  ;;  %v482_v23 = vpop.f32.mrb[9].mxu1  ;;  %3846 = vmatpush3.bf16.msra.mxu0 %v3843_v17 }
 0x285   :  { %v3847_v24 = vpack.c.bf16 %v528_v19, %v527_v20  ;;  %v483_v25 = vadd.f32 %v4791_v41, %v482_v23  ;;  %v867_v19 = vld [vmem:[#allocation10 + $0x8] sm:$0xff]  ;;  %v868_v20 = vld [vmem:[#allocation10 + $0x10] sm:$0xff] }
 0x286   :  { %v530_v26 = vmax.f32 %v488_v22, 0.0  ;;  %v3931_v21 = vpack.c.bf16 %v867_v19, %v866_v18  ;;  %v869_v22 = vld [vmem:[#allocation10 + $0x18] sm:$0xff] }
 0x287   :  { %v529_v27 = vmax.f32 %v483_v25, 0.0  ;;  %v3092_v28 = vpop.f32.mrb[10].mxu1  ;;  %3848 = vmatprep.subr.bf16.mxu0 %v3847_v24  ;;  %v3935_v23 = vpack.c.bf16 %v869_v22, %v868_v20  ;;  %v871_v25 = vld [vmem:[#allocation10 + $0x28] sm:$0xff] }
 0x288   :  { %v498_v29 = vadd.f32 %v3092_v28, %v4791_v41  ;;  %v492_v30 = vpop.f32.mrb[11].mxu1  ;;  %3850 = vmatpush3.bf16.msra.mxu0 %v3847_v24  ;;  %v870_v24 = vld [vmem:[#allocation10 + $0x20] sm:$0xff]  ;;  %3932 = vmatprep.subr.bf16.mxu1 %v3931_v21  ;;  %v873_v28 = vld [vmem:[#allocation10 + $0x38] sm:$0xff] }
 0x289   :  { %v3851_v31 = vpack.c.bf16 %v530_v26, %v529_v27  ;;  %v493_v32 = vadd.f32 %v4791_v41, %v492_v30  ;;  %v3939_v26 = vpack.c.bf16 %v871_v25, %v870_v24  ;;  %v872_v27 = vld [vmem:[#allocation10 + $0x30] sm:$0xff]  ;;  %v874_v30 = vld [vmem:[#allocation10 + $0x40] sm:$0xff] }
 0x28a   :  { %v532_v33 = vmax.f32 %v498_v29, 0.0  ;;  %v3943_v29 = vpack.c.bf16 %v873_v28, %v872_v27 }
 0x28b   :  { %v531_v34 = vmax.f32 %v493_v32, 0.0  ;;  %v3095_v35 = vpop.f32.mrb[12].mxu1  ;;  %3852 = vmatprep.subr.bf16.mxu0 %v3851_v31 }
 0x28c   :  { %v508_v36 = vadd.f32 %v3095_v35, %v4791_v41  ;;  %v502_v37 = vpop.f32.mrb[13].mxu1  ;;  %3854 = vmatpush3.bf16.msra.mxu0 %v3851_v31  ;;  %v875_v31 = vld [vmem:[#allocation10 + $0x48] sm:$0xff] }
 0x28d   :  { %v3855_v38 = vpack.c.bf16 %v532_v33, %v531_v34  ;;  %v503_v39 = vadd.f32 %v4791_v41, %v502_v37  ;;  %v3947_v32 = vpack.c.bf16 %v875_v31, %v874_v30  ;;  %v876_v33 = vld [vmem:[#allocation10 + $0x50] sm:$0xff]  ;;  %v877_v34 = vld [vmem:[#allocation10 + $0x58] sm:$0xff]  ;;  %v879_v37 = vld [vmem:[#allocation10 + $0x68] sm:$0xff] }
 0x28e   :  { %v534_v40 = vmax.f32 %v508_v36, 0.0  ;;  %v3951_v35 = vpack.c.bf16 %v877_v34, %v876_v33  ;;  %v878_v36 = vld [vmem:[#allocation10 + $0x60] sm:$0xff] }
 0x28f   :  { %v533_v42 = vmax.f32 %v503_v39, 0.0  ;;  %v3098_v43 = vpop.f32.mrb[14].mxu1  ;;  %3856 = vmatprep.subr.bf16.mxu0 %v3855_v38  ;;  %v880_v39 = vld [vmem:[#allocation10 + $0x70] sm:$0xff] }
 0x290   :  { %v518_v44 = vadd.f32 %v3098_v43, %v4791_v41  ;;  %v512_v46 = vpop.f32.mrb[15].mxu1  ;;  %3858 = vmatpush3.bf16.msra.mxu0 %v3855_v38  ;;  %v3955_v38 = vpack.c.bf16 %v879_v37, %v878_v36  ;;  %v4828_v43 = vld [vmem:[%s5051_s10] ss:$0 sm:$0xff] }
 0x291   :  { %v3859_v48 = vpack.c.bf16 %v534_v40, %v533_v42  ;;  %v513_v49 = vadd.f32 %v4791_v41, %v512_v46  ;;  %v881_v40 = vld [vmem:[#allocation10 + $0x78] sm:$0xff] }
 0x292   :  { %v536_v51 = vmax.f32 %v518_v44, 0.0  ;;  %v3959_v42 = vpack.c.bf16 %v881_v40, %v880_v39 }
 0x293   :  { %v535_v0 = vmax.f32 %v513_v49, 0.0  ;;  %3860 = vmatprep.subr.bf16.mxu0 %v3859_v48 }
 0x294   :  { %3862 = vmatpush3.bf16.msra.mxu0 %v3859_v48 }
 0x295   :  { %v3863_v1 = vpack.c.bf16 %v536_v51, %v535_v0 }
 0x297   :  { %3864 = vmatprep.subr.bf16.mxu0 %v3863_v1 }
 0x298   :  { %3866 = vmatpush3.bf16.msra.mxu0 %v3863_v1 }
 0x29b   :  { %3132 = vmatmul.mubr.f32.vlgmr.msra.gmra.mrb[16].mxu0 %v4742_v45 }
 0x29c   :  { %3134 = vmatprep.mubr.f32.mxu0 %v4744_v47 }
 0x29f   :  { %3135 = vmatmul.mubr.f32.gmra.mrb[18].mxu0 %v4748_v50 }
 0x2a0   :  { %3137 = vmatprep.mubr.f32.mxu0 %v4750_v52 }
 0x2a3   :  { %3138 = vmatmul.mubr.f32.gmra.mrb[20].mxu0 %v4754_v53 }
 0x2a4   :  { %3140 = vmatprep.mubr.f32.mxu0 %v4756_v54 }
 0x2a7   :  { %3141 = vmatmul.mubr.f32.gmra.mrb[22].mxu0 %v4760_v55 }
 0x2a8   :  { %3143 = vmatprep.mubr.f32.mxu0 %v4762_v56 }
 0x2ab   :  { %3144 = vmatmul.mubr.f32.gmra.mrb[24].mxu0 %v4766_v57 }
 0x2ac   :  { %3146 = vmatprep.mubr.f32.mxu0 %v4768_v58 }
 0x2af   :  { %3147 = vmatmul.mubr.f32.gmra.mrb[26].mxu0 %v4772_v59 }
 0x2b0   :  { %3149 = vmatprep.mubr.f32.mxu0 %v4774_v60 }
 0x2b3   :  { %3150 = vmatmul.mubr.f32.gmra.mrb[28].mxu0 %v4778_v61 }
 0x2b4   :  { %3152 = vmatprep.mubr.f32.mxu0 %v4780_v62 }
 0x2b7   :  { %3153 = vmatmul.mubr.f32.gmra.mrb[30].mxu0 %v4784_v63 }
 0x2b8   :  { %3243 = vmatprep.mubr.f32.mxu0 %v4739_v9 }
 0x36e   :  { %v3133_v41 = vpop.f32.mrb[16].mxu0 }
 0x36f   :  { %v620_v2 = vpop.f32.mrb[17].mxu0 }
 0x370   :  { %3187 = vmatprep.mubr.f32.mxu1 %v620_v2 }
 0x371   :  { %3188 = vmatmul.mubr.f32.vlgmr.msra.gmra.mrb[16].mxu1 %v3133_v41 }
 0x372   :  { %v3136_v3 = vpop.f32.mrb[18].mxu0  ;;  %3934 = vmatpush3.bf16.msra.mxu1 %v3931_v21 }
 0x373   :  { %v630_v4 = vpop.f32.mrb[19].mxu0  ;;  %3936 = vmatprep.subr.bf16.mxu1 %v3935_v23 }
 0x374   :  { %3190 = vmatprep.mubr.f32.mxu1 %v630_v4 }
 0x375   :  { %3191 = vmatmul.mubr.f32.gmra.mrb[18].mxu1 %v3136_v3 }
 0x376   :  { %v3139_v5 = vpop.f32.mrb[20].mxu0  ;;  %3938 = vmatpush3.bf16.msra.mxu1 %v3935_v23 }
 0x377   :  { %v640_v6 = vpop.f32.mrb[21].mxu0  ;;  %3940 = vmatprep.subr.bf16.mxu1 %v3939_v26 }
 0x378   :  { %3193 = vmatprep.mubr.f32.mxu1 %v640_v6 }
 0x379   :  { %3194 = vmatmul.mubr.f32.gmra.mrb[20].mxu1 %v3139_v5 }
 0x37a   :  { %v3142_v7 = vpop.f32.mrb[22].mxu0  ;;  %3942 = vmatpush3.bf16.msra.mxu1 %v3939_v26 }
 0x37b   :  { %v650_v8 = vpop.f32.mrb[23].mxu0  ;;  %3944 = vmatprep.subr.bf16.mxu1 %v3943_v29 }
 0x37c   :  { %3196 = vmatprep.mubr.f32.mxu1 %v650_v8 }
 0x37d   :  { %3197 = vmatmul.mubr.f32.gmra.mrb[22].mxu1 %v3142_v7 }
 0x37e   :  { %v3145_v10 = vpop.f32.mrb[24].mxu0  ;;  %3946 = vmatpush3.bf16.msra.mxu1 %v3943_v29 }
 0x37f   :  { %v660_v11 = vpop.f32.mrb[25].mxu0  ;;  %3948 = vmatprep.subr.bf16.mxu1 %v3947_v32 }
 0x380   :  { %3199 = vmatprep.mubr.f32.mxu1 %v660_v11 }
 0x381   :  { %3200 = vmatmul.mubr.f32.gmra.mrb[24].mxu1 %v3145_v10 }
 0x382   :  { %v3148_v12 = vpop.f32.mrb[26].mxu0  ;;  %3950 = vmatpush3.bf16.msra.mxu1 %v3947_v32 }
 0x383   :  { %v670_v13 = vpop.f32.mrb[27].mxu0  ;;  %3952 = vmatprep.subr.bf16.mxu1 %v3951_v35 }
 0x384   :  { %3202 = vmatprep.mubr.f32.mxu1 %v670_v13 }
 0x385   :  { %3203 = vmatmul.mubr.f32.gmra.mrb[26].mxu1 %v3148_v12 }
 0x386   :  { %v3151_v14 = vpop.f32.mrb[28].mxu0  ;;  %3954 = vmatpush3.bf16.msra.mxu1 %v3951_v35 }
 0x387   :  { %v680_v15 = vpop.f32.mrb[29].mxu0  ;;  %3956 = vmatprep.subr.bf16.mxu1 %v3955_v38 }
 0x388   :  { %3205 = vmatprep.mubr.f32.mxu1 %v680_v15 }
 0x389   :  { %3206 = vmatmul.mubr.f32.gmra.mrb[28].mxu1 %v3151_v14 }
 0x38a   :  { %v3154_v16 = vpop.f32.mrb[30].mxu0  ;;  %3958 = vmatpush3.bf16.msra.mxu1 %v3955_v38 }
 0x38b   :  { %v690_v17 = vpop.f32.mrb[31].mxu0  ;;  %3960 = vmatprep.subr.bf16.mxu1 %v3959_v42 }
 0x38c   :  { %3208 = vmatprep.mubr.f32.mxu1 %v690_v17 }
 0x38d   :  { %3209 = vmatmul.mubr.f32.gmra.mrb[30].mxu1 %v3154_v16 }
 0x38e   :  { %3962 = vmatpush3.bf16.msra.mxu1 %v3959_v42 }
 0x444   :  { %v3189_v44 = vpop.f32.mrb[16].mxu1 }
 0x445   :  { %v777_v46 = vadd.f32 %v3189_v44, %v4828_v43  ;;  %v771_v48 = vpop.f32.mrb[17].mxu1 }
 0x446   :  { %v772_v49 = vadd.f32 %v4828_v43, %v771_v48 }
 0x447   :  { %v851_v51 = vmax.f32 %v777_v46, 0.0 }
 0x448   :  { %v850_v0 = vmax.f32 %v772_v49, 0.0  ;;  %v3192_v1 = vpop.f32.mrb[18].mxu1 }
 0x449   :  { %v787_v41 = vadd.f32 %v3192_v1, %v4828_v43  ;;  %v781_v2 = vpop.f32.mrb[19].mxu1 }
 0x44a   :  { %v3899_v3 = vpack.c.bf16 %v851_v51, %v850_v0  ;;  %v782_v4 = vadd.f32 %v4828_v43, %v781_v2 }
 0x44b   :  { %v853_v5 = vmax.f32 %v787_v41, 0.0 }
 0x44c   :  { %v852_v6 = vmax.f32 %v782_v4, 0.0  ;;  %v3195_v7 = vpop.f32.mrb[20].mxu1  ;;  %3900 = vmatprep.subr.bf16.mxu0 %v3899_v3 }
 0x44d   :  { %v797_v8 = vadd.f32 %v3195_v7, %v4828_v43  ;;  %v791_v10 = vpop.f32.mrb[21].mxu1  ;;  %3902 = vmatpush3.bf16.msra.mxu0 %v3899_v3 }
 0x44e   :  { %v3903_v11 = vpack.c.bf16 %v853_v5, %v852_v6  ;;  %v792_v12 = vadd.f32 %v4828_v43, %v791_v10 }
 0x44f   :  { %v855_v13 = vmax.f32 %v797_v8, 0.0 }
 0x450   :  { %v854_v14 = vmax.f32 %v792_v12, 0.0  ;;  %v3198_v15 = vpop.f32.mrb[22].mxu1  ;;  %3904 = vmatprep.subr.bf16.mxu0 %v3903_v11 }
 0x451   :  { %v807_v16 = vadd.f32 %v3198_v15, %v4828_v43  ;;  %v801_v17 = vpop.f32.mrb[23].mxu1  ;;  %3906 = vmatpush3.bf16.msra.mxu0 %v3903_v11 }
 0x452   :  { %v3907_v18 = vpack.c.bf16 %v855_v13, %v854_v14  ;;  %v802_v19 = vadd.f32 %v4828_v43, %v801_v17 }
 0x453   :  { %v857_v20 = vmax.f32 %v807_v16, 0.0 }
 0x454   :  { %v856_v21 = vmax.f32 %v802_v19, 0.0  ;;  %v3201_v22 = vpop.f32.mrb[24].mxu1  ;;  %3908 = vmatprep.subr.bf16.mxu0 %v3907_v18  ;;  %v1196_v19 = vld [vmem:[#allocation11 + $0x8] sm:$0xff] }
 0x455   :  { %v817_v23 = vadd.f32 %v3201_v22, %v4828_v43  ;;  %v811_v24 = vpop.f32.mrb[25].mxu1  ;;  %3910 = vmatpush3.bf16.msra.mxu0 %v3907_v18  ;;  %v1195_v18 = vld [vmem:[#allocation11] sm:$0xff]  ;;  %v1198_v22 = vld [vmem:[#allocation11 + $0x18] sm:$0xff] }
 0x456   :  { %v3911_v25 = vpack.c.bf16 %v857_v20, %v856_v21  ;;  %v812_v26 = vadd.f32 %v4828_v43, %v811_v24  ;;  %v1197_v20 = vld [vmem:[#allocation11 + $0x10] sm:$0xff]  ;;  %v3995_v21 = vpack.c.bf16 %v1196_v19, %v1195_v18  ;;  %v1199_v24 = vld [vmem:[#allocation11 + $0x20] sm:$0xff] }
 0x457   :  { %v859_v27 = vmax.f32 %v817_v23, 0.0  ;;  %v3999_v23 = vpack.c.bf16 %v1198_v22, %v1197_v20 }
 0x458   :  { %v858_v28 = vmax.f32 %v812_v26, 0.0  ;;  %v3204_v29 = vpop.f32.mrb[26].mxu1  ;;  %3912 = vmatprep.subr.bf16.mxu0 %v3911_v25  ;;  %3996 = vmatprep.subr.bf16.mxu1 %v3995_v21 }
 0x459   :  { %v827_v30 = vadd.f32 %v3204_v29, %v4828_v43  ;;  %v821_v31 = vpop.f32.mrb[27].mxu1  ;;  %3914 = vmatpush3.bf16.msra.mxu0 %v3911_v25  ;;  %v1200_v25 = vld [vmem:[#allocation11 + $0x28] sm:$0xff] }
 0x45a   :  { %v3915_v32 = vpack.c.bf16 %v859_v27, %v858_v28  ;;  %v822_v33 = vadd.f32 %v4828_v43, %v821_v31  ;;  %v4003_v26 = vpack.c.bf16 %v1200_v25, %v1199_v24  ;;  %v1201_v27 = vld [vmem:[#allocation11 + $0x30] sm:$0xff]  ;;  %v1202_v28 = vld [vmem:[#allocation11 + $0x38] sm:$0xff]  ;;  %v1204_v31 = vld [vmem:[#allocation11 + $0x48] sm:$0xff] }
 0x45b   :  { %v861_v34 = vmax.f32 %v827_v30, 0.0  ;;  %v4007_v29 = vpack.c.bf16 %v1202_v28, %v1201_v27  ;;  %v1203_v30 = vld [vmem:[#allocation11 + $0x40] sm:$0xff] }
 0x45c   :  { %v860_v35 = vmax.f32 %v822_v33, 0.0  ;;  %v3207_v36 = vpop.f32.mrb[28].mxu1  ;;  %3916 = vmatprep.subr.bf16.mxu0 %v3915_v32  ;;  %v1205_v33 = vld [vmem:[#allocation11 + $0x50] sm:$0xff] }
 0x45d   :  { %v837_v37 = vadd.f32 %v3207_v36, %v4828_v43  ;;  %v831_v38 = vpop.f32.mrb[29].mxu1  ;;  %3918 = vmatpush3.bf16.msra.mxu0 %v3915_v32  ;;  %v4011_v32 = vpack.c.bf16 %v1204_v31, %v1203_v30  ;;  %v1207_v36 = vld [vmem:[#allocation11 + $0x60] sm:$0xff] }
 0x45e   :  { %v3919_v39 = vpack.c.bf16 %v861_v34, %v860_v35  ;;  %v832_v40 = vadd.f32 %v4828_v43, %v831_v38  ;;  %v1206_v34 = vld [vmem:[#allocation11 + $0x58] sm:$0xff] }
 0x45f   :  { %v863_v42 = vmax.f32 %v837_v37, 0.0  ;;  %v4015_v35 = vpack.c.bf16 %v1206_v34, %v1205_v33  ;;  %v1208_v37 = vld [vmem:[#allocation11 + $0x68] sm:$0xff] }
 0x460   :  { %v862_v44 = vmax.f32 %v832_v40, 0.0  ;;  %v3210_v46 = vpop.f32.mrb[30].mxu1  ;;  %3920 = vmatprep.subr.bf16.mxu0 %v3919_v39  ;;  %v4019_v38 = vpack.c.bf16 %v1208_v37, %v1207_v36  ;;  %v1210_v40 = vld [vmem:[#allocation11 + $0x78] sm:$0xff] }
 0x461   :  { %v847_v48 = vadd.f32 %v3210_v46, %v4828_v43  ;;  %v841_v49 = vpop.f32.mrb[31].mxu1  ;;  %3922 = vmatpush3.bf16.msra.mxu0 %v3919_v39  ;;  %v1209_v39 = vld [vmem:[#allocation11 + $0x70] sm:$0xff] }
 0x462   :  { %v3923_v51 = vpack.c.bf16 %v863_v42, %v862_v44  ;;  %v842_v0 = vadd.f32 %v4828_v43, %v841_v49  ;;  %v4023_v42 = vpack.c.bf16 %v1210_v40, %v1209_v39  ;;  %v4865_v44 = vld [vmem:[%s5052_s11] ss:$0 sm:$0xff] }
 0x463   :  { %v865_v1 = vmax.f32 %v847_v48, 0.0 }
 0x464   :  { %v864_v41 = vmax.f32 %v842_v0, 0.0  ;;  %3924 = vmatprep.subr.bf16.mxu0 %v3923_v51 }
 0x465   :  { %3926 = vmatpush3.bf16.msra.mxu0 %v3923_v51 }
 0x466   :  { %v3927_v2 = vpack.c.bf16 %v865_v1, %v864_v41 }
 0x468   :  { %3928 = vmatprep.subr.bf16.mxu0 %v3927_v2 }
 0x469   :  { %3930 = vmatpush3.bf16.msra.mxu0 %v3927_v2 }
 0x46c   :  { %3244 = vmatmul.mubr.f32.vlgmr.msra.gmra.mrb[32].mxu0 %v4742_v45 }
 0x46d   :  { %3246 = vmatprep.mubr.f32.mxu0 %v4744_v47 }
 0x470   :  { %3247 = vmatmul.mubr.f32.gmra.mrb[34].mxu0 %v4748_v50 }
 0x471   :  { %3249 = vmatprep.mubr.f32.mxu0 %v4750_v52 }
 0x474   :  { %3250 = vmatmul.mubr.f32.gmra.mrb[36].mxu0 %v4754_v53 }
 0x475   :  { %3252 = vmatprep.mubr.f32.mxu0 %v4756_v54 }
 0x478   :  { %3253 = vmatmul.mubr.f32.gmra.mrb[38].mxu0 %v4760_v55 }
 0x479   :  { %3255 = vmatprep.mubr.f32.mxu0 %v4762_v56 }
 0x47c   :  { %3256 = vmatmul.mubr.f32.gmra.mrb[40].mxu0 %v4766_v57 }
 0x47d   :  { %3258 = vmatprep.mubr.f32.mxu0 %v4768_v58 }
 0x480   :  { %3259 = vmatmul.mubr.f32.gmra.mrb[42].mxu0 %v4772_v59 }
 0x481   :  { %3261 = vmatprep.mubr.f32.mxu0 %v4774_v60 }
 0x484   :  { %3262 = vmatmul.mubr.f32.gmra.mrb[44].mxu0 %v4778_v61 }
 0x485   :  { %3264 = vmatprep.mubr.f32.mxu0 %v4780_v62 }
 0x488   :  { %3265 = vmatmul.mubr.f32.gmra.mrb[46].mxu0 %v4784_v63 }
 0x489   :  { %3355 = vmatprep.mubr.f32.mxu0 %v4739_v9 }
 0x53f   :  { %v3245_v43 = vpop.f32.mrb[32].mxu0 }
 0x540   :  { %v949_v3 = vpop.f32.mrb[33].mxu0 }
 0x541   :  { %3299 = vmatprep.mubr.f32.mxu1 %v949_v3 }
 0x542   :  { %3300 = vmatmul.mubr.f32.vlgmr.msra.gmra.mrb[32].mxu1 %v3245_v43 }
 0x543   :  { %v3248_v4 = vpop.f32.mrb[34].mxu0  ;;  %3998 = vmatpush3.bf16.msra.mxu1 %v3995_v21 }
 0x544   :  { %v959_v5 = vpop.f32.mrb[35].mxu0  ;;  %4000 = vmatprep.subr.bf16.mxu1 %v3999_v23 }
 0x545   :  { %3302 = vmatprep.mubr.f32.mxu1 %v959_v5 }
 0x546   :  { %3303 = vmatmul.mubr.f32.gmra.mrb[34].mxu1 %v3248_v4 }
 0x547   :  { %v3251_v6 = vpop.f32.mrb[36].mxu0  ;;  %4002 = vmatpush3.bf16.msra.mxu1 %v3999_v23 }
 0x548   :  { %v969_v7 = vpop.f32.mrb[37].mxu0  ;;  %4004 = vmatprep.subr.bf16.mxu1 %v4003_v26 }
 0x549   :  { %3305 = vmatprep.mubr.f32.mxu1 %v969_v7 }
 0x54a   :  { %3306 = vmatmul.mubr.f32.gmra.mrb[36].mxu1 %v3251_v6 }
 0x54b   :  { %v3254_v8 = vpop.f32.mrb[38].mxu0  ;;  %4006 = vmatpush3.bf16.msra.mxu1 %v4003_v26 }
 0x54c   :  { %v979_v10 = vpop.f32.mrb[39].mxu0  ;;  %4008 = vmatprep.subr.bf16.mxu1 %v4007_v29 }
 0x54d   :  { %3308 = vmatprep.mubr.f32.mxu1 %v979_v10 }
 0x54e   :  { %3309 = vmatmul.mubr.f32.gmra.mrb[38].mxu1 %v3254_v8 }
 0x54f   :  { %v3257_v11 = vpop.f32.mrb[40].mxu0  ;;  %4010 = vmatpush3.bf16.msra.mxu1 %v4007_v29 }
 0x550   :  { %v989_v12 = vpop.f32.mrb[41].mxu0  ;;  %4012 = vmatprep.subr.bf16.mxu1 %v4011_v32 }
 0x551   :  { %3311 = vmatprep.mubr.f32.mxu1 %v989_v12 }
 0x552   :  { %3312 = vmatmul.mubr.f32.gmra.mrb[40].mxu1 %v3257_v11 }
 0x553   :  { %v3260_v9 = vpop.f32.mrb[42].mxu0  ;;  %4014 = vmatpush3.bf16.msra.mxu1 %v4011_v32 }
 0x554   :  { %v999_v13 = vpop.f32.mrb[43].mxu0  ;;  %4016 = vmatprep.subr.bf16.mxu1 %v4015_v35 }
 0x555   :  { %3314 = vmatprep.mubr.f32.mxu1 %v999_v13 }
 0x556   :  { %3315 = vmatmul.mubr.f32.gmra.mrb[42].mxu1 %v3260_v9 }
 0x557   :  { %v3263_v14 = vpop.f32.mrb[44].mxu0  ;;  %4018 = vmatpush3.bf16.msra.mxu1 %v4015_v35 }
 0x558   :  { %v1009_v15 = vpop.f32.mrb[45].mxu0  ;;  %4020 = vmatprep.subr.bf16.mxu1 %v4019_v38 }
 0x559   :  { %3317 = vmatprep.mubr.f32.mxu1 %v1009_v15 }
 0x55a   :  { %3318 = vmatmul.mubr.f32.gmra.mrb[44].mxu1 %v3263_v14 }
 0x55b   :  { %v3266_v16 = vpop.f32.mrb[46].mxu0  ;;  %4022 = vmatpush3.bf16.msra.mxu1 %v4019_v38 }
 0x55c   :  { %v1019_v17 = vpop.f32.mrb[47].mxu0  ;;  %4024 = vmatprep.subr.bf16.mxu1 %v4023_v42 }
 0x55d   :  { %3320 = vmatprep.mubr.f32.mxu1 %v1019_v17 }
 0x55e   :  { %3321 = vmatmul.mubr.f32.gmra.mrb[46].mxu1 %v3266_v16 }
 0x55f   :  { %4026 = vmatpush3.bf16.msra.mxu1 %v4023_v42 }
 0x615   :  { %v3301_v46 = vpop.f32.mrb[32].mxu1 }
 0x616   :  { %v1106_v48 = vadd.f32 %v3301_v46, %v4865_v44  ;;  %v1100_v49 = vpop.f32.mrb[33].mxu1 }
 0x617   :  { %v1101_v51 = vadd.f32 %v4865_v44, %v1100_v49 }
 0x618   :  { %v1180_v0 = vmax.f32 %v1106_v48, 0.0 }
 0x619   :  { %v1179_v1 = vmax.f32 %v1101_v51, 0.0  ;;  %v3304_v41 = vpop.f32.mrb[34].mxu1 }
 0x61a   :  { %v1116_v2 = vadd.f32 %v3304_v41, %v4865_v44  ;;  %v1110_v43 = vpop.f32.mrb[35].mxu1 }
 0x61b   :  { %v3963_v3 = vpack.c.bf16 %v1180_v0, %v1179_v1  ;;  %v1111_v4 = vadd.f32 %v4865_v44, %v1110_v43 }
 0x61c   :  { %v1182_v5 = vmax.f32 %v1116_v2, 0.0 }
 0x61d   :  { %v1181_v6 = vmax.f32 %v1111_v4, 0.0  ;;  %v3307_v7 = vpop.f32.mrb[36].mxu1  ;;  %3964 = vmatprep.subr.bf16.mxu0 %v3963_v3  ;;  %v1525_v4 = vld [vmem:[#allocation13 + $0x8] sm:$0xff] }
 0x61e   :  { %v1126_v8 = vadd.f32 %v3307_v7, %v4865_v44  ;;  %v1120_v10 = vpop.f32.mrb[37].mxu1  ;;  %3966 = vmatpush3.bf16.msra.mxu0 %v3963_v3  ;;  %v1524_v3 = vld [vmem:[#allocation13] sm:$0xff]  ;;  %v1527_v7 = vld [vmem:[#allocation13 + $0x18] sm:$0xff] }
 0x61f   :  { %v3967_v11 = vpack.c.bf16 %v1182_v5, %v1181_v6  ;;  %v1121_v12 = vadd.f32 %v4865_v44, %v1120_v10  ;;  %v1526_v5 = vld [vmem:[#allocation13 + $0x10] sm:$0xff]  ;;  %v4059_v6 = vpack.c.bf16 %v1525_v4, %v1524_v3  ;;  %v1528_v10 = vld [vmem:[#allocation13 + $0x20] sm:$0xff] }
 0x620   :  { %v1184_v9 = vmax.f32 %v1126_v8, 0.0  ;;  %v4063_v8 = vpack.c.bf16 %v1527_v7, %v1526_v5 }
 0x621   :  { %v1183_v13 = vmax.f32 %v1121_v12, 0.0  ;;  %v3310_v14 = vpop.f32.mrb[38].mxu1  ;;  %3968 = vmatprep.subr.bf16.mxu0 %v3967_v11  ;;  %4060 = vmatprep.subr.bf16.mxu1 %v4059_v6 }
 0x622   :  { %v1136_v15 = vadd.f32 %v3310_v14, %v4865_v44  ;;  %v1130_v16 = vpop.f32.mrb[39].mxu1  ;;  %3970 = vmatpush3.bf16.msra.mxu0 %v3967_v11  ;;  %v1529_v11 = vld [vmem:[#allocation13 + $0x28] sm:$0xff] }
 0x623   :  { %v3971_v17 = vpack.c.bf16 %v1184_v9, %v1183_v13  ;;  %v1131_v18 = vadd.f32 %v4865_v44, %v1130_v16  ;;  %v4067_v12 = vpack.c.bf16 %v1529_v11, %v1528_v10  ;;  %v1530_v9 = vld [vmem:[#allocation13 + $0x30] sm:$0xff]  ;;  %v1531_v13 = vld [vmem:[#allocation13 + $0x38] sm:$0xff]  ;;  %v1533_v16 = vld [vmem:[#allocation13 + $0x48] sm:$0xff] }
 0x624   :  { %v1186_v19 = vmax.f32 %v1136_v15, 0.0  ;;  %v4071_v14 = vpack.c.bf16 %v1531_v13, %v1530_v9  ;;  %v1532_v15 = vld [vmem:[#allocation13 + $0x40] sm:$0xff] }
 0x625   :  { %v1185_v20 = vmax.f32 %v1131_v18, 0.0  ;;  %v3313_v21 = vpop.f32.mrb[40].mxu1  ;;  %3972 = vmatprep.subr.bf16.mxu0 %v3971_v17  ;;  %v1534_v18 = vld [vmem:[#allocation13 + $0x50] sm:$0xff] }
 0x626   :  { %v1146_v22 = vadd.f32 %v3313_v21, %v4865_v44  ;;  %v1140_v23 = vpop.f32.mrb[41].mxu1  ;;  %3974 = vmatpush3.bf16.msra.mxu0 %v3971_v17  ;;  %v4075_v17 = vpack.c.bf16 %v1533_v16, %v1532_v15  ;;  %v1536_v21 = vld [vmem:[#allocation13 + $0x60] sm:$0xff] }
 0x627   :  { %v3975_v24 = vpack.c.bf16 %v1186_v19, %v1185_v20  ;;  %v1141_v25 = vadd.f32 %v4865_v44, %v1140_v23  ;;  %v1535_v19 = vld [vmem:[#allocation13 + $0x58] sm:$0xff] }
 0x628   :  { %v1188_v26 = vmax.f32 %v1146_v22, 0.0  ;;  %v4079_v20 = vpack.c.bf16 %v1535_v19, %v1534_v18  ;;  %v1537_v22 = vld [vmem:[#allocation13 + $0x68] sm:$0xff] }
 0x629   :  { %v1187_v27 = vmax.f32 %v1141_v25, 0.0  ;;  %v3316_v28 = vpop.f32.mrb[42].mxu1  ;;  %3976 = vmatprep.subr.bf16.mxu0 %v3975_v24  ;;  %v4083_v23 = vpack.c.bf16 %v1537_v22, %v1536_v21  ;;  %v1539_v25 = vld [vmem:[#allocation13 + $0x78] sm:$0xff]  ;;  %v4922_v21 = vld [vmem:[#allocation2 + $0x8] sm:$0xff]  ;;  %v4925_v22 = vld [vmem:[#allocation2 + $0x10] sm:$0xff] }
 0x62a   :  { %v1156_v29 = vadd.f32 %v3316_v28, %v4865_v44  ;;  %v1150_v30 = vpop.f32.mrb[43].mxu1  ;;  %3978 = vmatpush3.bf16.msra.mxu0 %v3975_v24  ;;  %v1538_v24 = vld [vmem:[#allocation13 + $0x70] sm:$0xff] }
 0x62b   :  { %v3979_v31 = vpack.c.bf16 %v1188_v26, %v1187_v27  ;;  %v1151_v32 = vadd.f32 %v4865_v44, %v1150_v30  ;;  %v4087_v26 = vpack.c.bf16 %v1539_v25, %v1538_v24  ;;  %v4904_v27 = vld [vmem:[%s5053_s12] ss:$0 sm:$0xff]  ;;  %v4934_v25 = vld [vmem:[#allocation2 + $0x28] sm:$0xff] }
 0x62c   :  { %v1190_v33 = vmax.f32 %v1156_v29, 0.0  ;;  %v4931_v24 = vld [vmem:[#allocation2 + $0x20] sm:$0xff] }
 0x62d   :  { %v1189_v34 = vmax.f32 %v1151_v32, 0.0  ;;  %v3319_v35 = vpop.f32.mrb[44].mxu1  ;;  %3980 = vmatprep.subr.bf16.mxu0 %v3979_v31 }
 0x62e   :  { %v1166_v36 = vadd.f32 %v3319_v35, %v4865_v44  ;;  %v1160_v37 = vpop.f32.mrb[45].mxu1  ;;  %3982 = vmatpush3.bf16.msra.mxu0 %v3979_v31 }
 0x62f   :  { %v3983_v38 = vpack.c.bf16 %v1190_v33, %v1189_v34  ;;  %v1161_v39 = vadd.f32 %v4865_v44, %v1160_v37 }
 0x630   :  { %v1192_v40 = vmax.f32 %v1166_v36, 0.0 }
 0x631   :  { %v1191_v42 = vmax.f32 %v1161_v39, 0.0  ;;  %v3322_v46 = vpop.f32.mrb[46].mxu1  ;;  %3984 = vmatprep.subr.bf16.mxu0 %v3983_v38 }
 0x632   :  { %v1176_v48 = vadd.f32 %v3322_v46, %v4865_v44  ;;  %v1170_v49 = vpop.f32.mrb[47].mxu1  ;;  %3986 = vmatpush3.bf16.msra.mxu0 %v3983_v38 }
 0x633   :  { %v3987_v51 = vpack.c.bf16 %v1192_v40, %v1191_v42  ;;  %v1171_v0 = vadd.f32 %v4865_v44, %v1170_v49 }
 0x634   :  { %v1194_v1 = vmax.f32 %v1176_v48, 0.0 }
 0x635   :  { %v1193_v41 = vmax.f32 %v1171_v0, 0.0  ;;  %3988 = vmatprep.subr.bf16.mxu0 %v3987_v51 }
 0x636   :  { %3990 = vmatpush3.bf16.msra.mxu0 %v3987_v51 }
 0x637   :  { %v3991_v2 = vpack.c.bf16 %v1194_v1, %v1193_v41 }
 0x639   :  { %3992 = vmatprep.subr.bf16.mxu0 %v3991_v2 }
 0x63a   :  { %3994 = vmatpush3.bf16.msra.mxu0 %v3991_v2 }
 0x63d   :  { %3356 = vmatmul.mubr.f32.vlgmr.msra.gmra.mrb[48].mxu0 %v4742_v45  ;;  %v4898_v45 = vld [vmem:[#allocation2] sm:$0xff] }
 0x63e   :  { %3358 = vmatprep.mubr.f32.mxu0 %v4744_v47 }
 0x641   :  { %3359 = vmatmul.mubr.f32.gmra.mrb[50].mxu0 %v4748_v50 }
 0x642   :  { %3361 = vmatprep.mubr.f32.mxu0 %v4750_v52 }
 0x645   :  { %3362 = vmatmul.mubr.f32.gmra.mrb[52].mxu0 %v4754_v53 }
 0x646   :  { %3364 = vmatprep.mubr.f32.mxu0 %v4756_v54 }
 0x649   :  { %3365 = vmatmul.mubr.f32.gmra.mrb[54].mxu0 %v4760_v55 }
 0x64a   :  { %3367 = vmatprep.mubr.f32.mxu0 %v4762_v56 }
 0x64d   :  { %3368 = vmatmul.mubr.f32.gmra.mrb[56].mxu0 %v4766_v57 }
 0x64e   :  { %3370 = vmatprep.mubr.f32.mxu0 %v4768_v58 }
 0x651   :  { %3371 = vmatmul.mubr.f32.gmra.mrb[58].mxu0 %v4772_v59 }
 0x652   :  { %3373 = vmatprep.mubr.f32.mxu0 %v4774_v60 }
 0x655   :  { %3374 = vmatmul.mubr.f32.gmra.mrb[60].mxu0 %v4778_v61 }
 0x656   :  { %3376 = vmatprep.mubr.f32.mxu0 %v4780_v62 }
 0x659   :  { %3377 = vmatmul.mubr.f32.gmra.mrb[62].mxu0 %v4784_v63 }
 0x65a   :  { %3467 = vmatprep.mubr.f32.mxu0 %v4898_v45 }
 0x710   :  { %v3357_v47 = vpop.f32.mrb[48].mxu0 }
 0x711   :  { %v1278_v50 = vpop.f32.mrb[49].mxu0 }
 0x712   :  { %3411 = vmatprep.mubr.f32.mxu1 %v1278_v50 }
 0x713   :  { %3412 = vmatmul.mubr.f32.vlgmr.msra.gmra.mrb[48].mxu1 %v3357_v47 }
 0x714   :  { %v3360_v52 = vpop.f32.mrb[50].mxu0  ;;  %4062 = vmatpush3.bf16.msra.mxu1 %v4059_v6 }
 0x715   :  { %v1288_v53 = vpop.f32.mrb[51].mxu0  ;;  %4064 = vmatprep.subr.bf16.mxu1 %v4063_v8 }
 0x716   :  { %3414 = vmatprep.mubr.f32.mxu1 %v1288_v53 }
 0x717   :  { %3415 = vmatmul.mubr.f32.gmra.mrb[50].mxu1 %v3360_v52 }
 0x718   :  { %v3363_v54 = vpop.f32.mrb[52].mxu0  ;;  %4066 = vmatpush3.bf16.msra.mxu1 %v4063_v8 }
 0x719   :  { %v1298_v55 = vpop.f32.mrb[53].mxu0  ;;  %4068 = vmatprep.subr.bf16.mxu1 %v4067_v12 }
 0x71a   :  { %3417 = vmatprep.mubr.f32.mxu1 %v1298_v55 }
 0x71b   :  { %3418 = vmatmul.mubr.f32.gmra.mrb[52].mxu1 %v3363_v54 }
 0x71c   :  { %v3366_v56 = vpop.f32.mrb[54].mxu0  ;;  %4070 = vmatpush3.bf16.msra.mxu1 %v4067_v12 }
 0x71d   :  { %v1308_v57 = vpop.f32.mrb[55].mxu0  ;;  %4072 = vmatprep.subr.bf16.mxu1 %v4071_v14 }
 0x71e   :  { %3420 = vmatprep.mubr.f32.mxu1 %v1308_v57 }
 0x71f   :  { %3421 = vmatmul.mubr.f32.gmra.mrb[54].mxu1 %v3366_v56 }
 0x720   :  { %v3369_v58 = vpop.f32.mrb[56].mxu0  ;;  %4074 = vmatpush3.bf16.msra.mxu1 %v4071_v14 }
 0x721   :  { %v1318_v59 = vpop.f32.mrb[57].mxu0  ;;  %4076 = vmatprep.subr.bf16.mxu1 %v4075_v17 }
 0x722   :  { %3423 = vmatprep.mubr.f32.mxu1 %v1318_v59 }
 0x723   :  { %3424 = vmatmul.mubr.f32.gmra.mrb[56].mxu1 %v3369_v58 }
 0x724   :  { %v3372_v60 = vpop.f32.mrb[58].mxu0  ;;  %4078 = vmatpush3.bf16.msra.mxu1 %v4075_v17 }
 0x725   :  { %v1328_v61 = vpop.f32.mrb[59].mxu0  ;;  %4080 = vmatprep.subr.bf16.mxu1 %v4079_v20 }
 0x726   :  { %3426 = vmatprep.mubr.f32.mxu1 %v1328_v61 }
 0x727   :  { %3427 = vmatmul.mubr.f32.gmra.mrb[58].mxu1 %v3372_v60 }
 0x728   :  { %v3375_v62 = vpop.f32.mrb[60].mxu0  ;;  %4082 = vmatpush3.bf16.msra.mxu1 %v4079_v20 }
 0x729   :  { %v1338_v63 = vpop.f32.mrb[61].mxu0  ;;  %4084 = vmatprep.subr.bf16.mxu1 %v4083_v23 }
 0x72a   :  { %3429 = vmatprep.mubr.f32.mxu1 %v1338_v63 }
 0x72b   :  { %3430 = vmatmul.mubr.f32.gmra.mrb[60].mxu1 %v3375_v62 }
 0x72c   :  { %v3378_v44 = vpop.f32.mrb[62].mxu0  ;;  %4086 = vmatpush3.bf16.msra.mxu1 %v4083_v23  ;;  %v4928_v23 = vld [vmem:[#allocation2 + $0x18] sm:$0xff] }
 0x72d   :  { %v1348_v43 = vpop.f32.mrb[63].mxu0  ;;  %4088 = vmatprep.subr.bf16.mxu1 %v4087_v26 }
 0x72e   :  { %3432 = vmatprep.mubr.f32.mxu1 %v1348_v43 }
 0x72f   :  { %3433 = vmatmul.mubr.f32.gmra.mrb[62].mxu1 %v3378_v44 }
 0x730   :  { %4090 = vmatpush3.bf16.msra.mxu1 %v4087_v26  ;;  %v4937_v26 = vld [vmem:[#allocation2 + $0x30] sm:$0xff] }
 0x7e6   :  { %v3413_v28 = vpop.f32.mrb[48].mxu1 }
 0x7e7   :  { %v1435_v29 = vadd.f32 %v3413_v28, %v4904_v27  ;;  %v1429_v30 = vpop.f32.mrb[49].mxu1  ;;  %v4943_v28 = vld [vmem:[#allocation2 + $0x40] sm:$0xff] }
 0x7e8   :  { %v1430_v31 = vadd.f32 %v4904_v27, %v1429_v30  ;;  %v4949_v30 = vld [vmem:[#allocation2 + $0x50] sm:$0xff] }
 0x7e9   :  { %v1509_v32 = vmax.f32 %v1435_v29, 0.0  ;;  %v4946_v29 = vld [vmem:[#allocation2 + $0x48] sm:$0xff] }
 0x7ea   :  { %v1508_v33 = vmax.f32 %v1430_v31, 0.0  ;;  %v3416_v34 = vpop.f32.mrb[50].mxu1  ;;  %v4952_v31 = vld [vmem:[#allocation2 + $0x58] sm:$0xff] }
 0x7eb   :  { %v1445_v35 = vadd.f32 %v3416_v34, %v4904_v27  ;;  %v1439_v36 = vpop.f32.mrb[51].mxu1  ;;  %v4961_v34 = vld [vmem:[#allocation2 + $0x70] sm:$0xff] }
 0x7ec   :  { %v4027_v37 = vpack.c.bf16 %v1509_v32, %v1508_v33  ;;  %v1440_v38 = vadd.f32 %v4904_v27, %v1439_v36  ;;  %v4955_v32 = vld [vmem:[#allocation2 + $0x60] sm:$0xff]  ;;  %v4958_v33 = vld [vmem:[#allocation2 + $0x68] sm:$0xff] }
 0x7ed   :  { %v1511_v39 = vmax.f32 %v1445_v35, 0.0  ;;  %v4964_v35 = vld [vmem:[#allocation2 + $0x78] sm:$0xff] }
 0x7ee   :  { %v1510_v40 = vmax.f32 %v1440_v38, 0.0  ;;  %v3419_v42 = vpop.f32.mrb[52].mxu1  ;;  %4028 = vmatprep.subr.bf16.mxu0 %v4027_v37 }
 0x7ef   :  { %v1455_v46 = vadd.f32 %v3419_v42, %v4904_v27  ;;  %v1449_v48 = vpop.f32.mrb[53].mxu1  ;;  %4030 = vmatpush3.bf16.msra.mxu0 %v4027_v37 }
 0x7f0   :  { %v4031_v49 = vpack.c.bf16 %v1511_v39, %v1510_v40  ;;  %v1450_v51 = vadd.f32 %v4904_v27, %v1449_v48 }
 0x7f1   :  { %v1513_v0 = vmax.f32 %v1455_v46, 0.0 }
 0x7f2   :  { %v1512_v1 = vmax.f32 %v1450_v51, 0.0  ;;  %v3422_v41 = vpop.f32.mrb[54].mxu1  ;;  %4032 = vmatprep.subr.bf16.mxu0 %v4031_v49 }
 0x7f3   :  { %v1465_v2 = vadd.f32 %v3422_v41, %v4904_v27  ;;  %v1459_v47 = vpop.f32.mrb[55].mxu1  ;;  %4034 = vmatpush3.bf16.msra.mxu0 %v4031_v49 }
 0x7f4   :  { %v4035_v50 = vpack.c.bf16 %v1513_v0, %v1512_v1  ;;  %v1460_v52 = vadd.f32 %v4904_v27, %v1459_v47 }
 0x7f5   :  { %v1515_v53 = vmax.f32 %v1465_v2, 0.0 }
 0x7f6   :  { %v1514_v54 = vmax.f32 %v1460_v52, 0.0  ;;  %v3425_v55 = vpop.f32.mrb[56].mxu1  ;;  %4036 = vmatprep.subr.bf16.mxu0 %v4035_v50  ;;  %v1853_v52 = vld [vmem:[#allocation14] sm:$0xff] }
 0x7f7   :  { %v1475_v56 = vadd.f32 %v3425_v55, %v4904_v27  ;;  %v1469_v57 = vpop.f32.mrb[57].mxu1  ;;  %4038 = vmatpush3.bf16.msra.mxu0 %v4035_v50 }
 0x7f8   :  { %v4039_v58 = vpack.c.bf16 %v1515_v53, %v1514_v54  ;;  %v1470_v59 = vadd.f32 %v4904_v27, %v1469_v57  ;;  %v1854_v53 = vld [vmem:[#allocation14 + $0x8] sm:$0xff]  ;;  %v1855_v54 = vld [vmem:[#allocation14 + $0x10] sm:$0xff] }
 0x7f9   :  { %v1517_v60 = vmax.f32 %v1475_v56, 0.0  ;;  %v4123_v55 = vpack.c.bf16 %v1854_v53, %v1853_v52  ;;  %v1856_v56 = vld [vmem:[#allocation14 + $0x18] sm:$0xff] }
 0x7fa   :  { %v1516_v61 = vmax.f32 %v1470_v59, 0.0  ;;  %v3428_v62 = vpop.f32.mrb[58].mxu1  ;;  %4040 = vmatprep.subr.bf16.mxu0 %v4039_v58  ;;  %v4127_v57 = vpack.c.bf16 %v1856_v56, %v1855_v54  ;;  %v1858_v59 = vld [vmem:[#allocation14 + $0x28] sm:$0xff] }
 0x7fb   :  { %v1485_v63 = vadd.f32 %v3428_v62, %v4904_v27  ;;  %v1479_v44 = vpop.f32.mrb[59].mxu1  ;;  %4042 = vmatpush3.bf16.msra.mxu0 %v4039_v58  ;;  %v1857_v58 = vld [vmem:[#allocation14 + $0x20] sm:$0xff]  ;;  %4124 = vmatprep.subr.bf16.mxu1 %v4123_v55  ;;  %v1860_v62 = vld [vmem:[#allocation14 + $0x38] sm:$0xff] }
 0x7fc   :  { %v4043_v43 = vpack.c.bf16 %v1517_v60, %v1516_v61  ;;  %v1480_v3 = vadd.f32 %v4904_v27, %v1479_v44  ;;  %v4131_v60 = vpack.c.bf16 %v1858_v59, %v1857_v58  ;;  %v1859_v61 = vld [vmem:[#allocation14 + $0x30] sm:$0xff]  ;;  %v1861_v44 = vld [vmem:[#allocation14 + $0x40] sm:$0xff] }
 0x7fd   :  { %v1519_v4 = vmax.f32 %v1485_v63, 0.0  ;;  %v4135_v63 = vpack.c.bf16 %v1860_v62, %v1859_v61 }
 0x7fe   :  { %v1518_v5 = vmax.f32 %v1480_v3, 0.0  ;;  %v3431_v6 = vpop.f32.mrb[60].mxu1  ;;  %4044 = vmatprep.subr.bf16.mxu0 %v4043_v43 }
 0x7ff   :  { %v1495_v7 = vadd.f32 %v3431_v6, %v4904_v27  ;;  %v1489_v8 = vpop.f32.mrb[61].mxu1  ;;  %4046 = vmatpush3.bf16.msra.mxu0 %v4043_v43  ;;  %v1862_v43 = vld [vmem:[#allocation14 + $0x48] sm:$0xff] }
 0x800   :  { %v4047_v10 = vpack.c.bf16 %v1519_v4, %v1518_v5  ;;  %v1490_v11 = vadd.f32 %v4904_v27, %v1489_v8  ;;  %v4139_v3 = vpack.c.bf16 %v1862_v43, %v1861_v44  ;;  %v1863_v4 = vld [vmem:[#allocation14 + $0x50] sm:$0xff]  ;;  %v1864_v5 = vld [vmem:[#allocation14 + $0x58] sm:$0xff]  ;;  %v1866_v8 = vld [vmem:[#allocation14 + $0x68] sm:$0xff] }
 0x801   :  { %v1521_v12 = vmax.f32 %v1495_v7, 0.0  ;;  %v4143_v6 = vpack.c.bf16 %v1864_v5, %v1863_v4  ;;  %v1865_v7 = vld [vmem:[#allocation14 + $0x60] sm:$0xff] }
 0x802   :  { %v1520_v9 = vmax.f32 %v1490_v11, 0.0  ;;  %v3434_v13 = vpop.f32.mrb[62].mxu1  ;;  %4048 = vmatprep.subr.bf16.mxu0 %v4047_v10  ;;  %v1867_v11 = vld [vmem:[#allocation14 + $0x70] sm:$0xff] }
 0x803   :  { %v1505_v14 = vadd.f32 %v3434_v13, %v4904_v27  ;;  %v1499_v15 = vpop.f32.mrb[63].mxu1  ;;  %4050 = vmatpush3.bf16.msra.mxu0 %v4047_v10  ;;  %v4147_v10 = vpack.c.bf16 %v1866_v8, %v1865_v7  ;;  %v4971_v13 = vld [vmem:[%s5054_s13] ss:$0 sm:$0xff] }
 0x804   :  { %v4051_v16 = vpack.c.bf16 %v1521_v12, %v1520_v9  ;;  %v1500_v17 = vadd.f32 %v4904_v27, %v1499_v15  ;;  %v4940_v27 = vld [vmem:[#allocation2 + $0x38] sm:$0xff] }
 0x805   :  { %v1523_v18 = vmax.f32 %v1505_v14, 0.0  ;;  %v1868_v12 = vld [vmem:[#allocation14 + $0x78] sm:$0xff] }
 0x806   :  { %v1522_v19 = vmax.f32 %v1500_v17, 0.0  ;;  %4052 = vmatprep.subr.bf16.mxu0 %v4051_v16  ;;  %v4151_v9 = vpack.c.bf16 %v1868_v12, %v1867_v11 }
 0x807   :  { %4054 = vmatpush3.bf16.msra.mxu0 %v4051_v16 }
 0x808   :  { %v4055_v20 = vpack.c.bf16 %v1523_v18, %v1522_v19 }
 0x80a   :  { %4056 = vmatprep.subr.bf16.mxu0 %v4055_v20 }
 0x80b   :  { %4058 = vmatpush3.bf16.msra.mxu0 %v4055_v20 }
 0x80e   :  { %3468 = vmatmul.mubr.f32.vlgmr.msra.gmra.mrb[64].mxu0 %v4922_v21 }
 0x80f   :  { %3470 = vmatprep.mubr.f32.mxu0 %v4925_v22 }
 0x812   :  { %3471 = vmatmul.mubr.f32.gmra.mrb[66].mxu0 %v4928_v23 }
 0x813   :  { %3473 = vmatprep.mubr.f32.mxu0 %v4931_v24 }
 0x816   :  { %3474 = vmatmul.mubr.f32.gmra.mrb[68].mxu0 %v4934_v25 }
 0x817   :  { %3476 = vmatprep.mubr.f32.mxu0 %v4937_v26 }
 0x81a   :  { %3477 = vmatmul.mubr.f32.gmra.mrb[70].mxu0 %v4940_v27 }
 0x81b   :  { %3479 = vmatprep.mubr.f32.mxu0 %v4943_v28 }
 0x81e   :  { %3480 = vmatmul.mubr.f32.gmra.mrb[72].mxu0 %v4946_v29 }
 0x81f   :  { %3482 = vmatprep.mubr.f32.mxu0 %v4949_v30 }
 0x822   :  { %3483 = vmatmul.mubr.f32.gmra.mrb[74].mxu0 %v4952_v31 }
 0x823   :  { %3485 = vmatprep.mubr.f32.mxu0 %v4955_v32 }
 0x826   :  { %3486 = vmatmul.mubr.f32.gmra.mrb[76].mxu0 %v4958_v33 }
 0x827   :  { %3488 = vmatprep.mubr.f32.mxu0 %v4961_v34 }
 0x82a   :  { %3489 = vmatmul.mubr.f32.gmra.mrb[78].mxu0 %v4964_v35 }
 0x82b   :  { %3579 = vmatprep.mubr.f32.mxu0 %v4898_v45 }
 0x8e1   :  { %v3469_v36 = vpop.f32.mrb[64].mxu0 }
 0x8e2   :  { %v1607_v37 = vpop.f32.mrb[65].mxu0 }
 0x8e3   :  { %3523 = vmatprep.mubr.f32.mxu1 %v1607_v37 }
 0x8e4   :  { %3524 = vmatmul.mubr.f32.vlgmr.msra.gmra.mrb[64].mxu1 %v3469_v36 }
 0x8e5   :  { %v3472_v38 = vpop.f32.mrb[66].mxu0  ;;  %4126 = vmatpush3.bf16.msra.mxu1 %v4123_v55 }
 0x8e6   :  { %v1617_v39 = vpop.f32.mrb[67].mxu0  ;;  %4128 = vmatprep.subr.bf16.mxu1 %v4127_v57 }
 0x8e7   :  { %3526 = vmatprep.mubr.f32.mxu1 %v1617_v39 }
 0x8e8   :  { %3527 = vmatmul.mubr.f32.gmra.mrb[66].mxu1 %v3472_v38 }
 0x8e9   :  { %v3475_v40 = vpop.f32.mrb[68].mxu0  ;;  %4130 = vmatpush3.bf16.msra.mxu1 %v4127_v57 }
 0x8ea   :  { %v1627_v42 = vpop.f32.mrb[69].mxu0  ;;  %4132 = vmatprep.subr.bf16.mxu1 %v4131_v60 }
 0x8eb   :  { %3529 = vmatprep.mubr.f32.mxu1 %v1627_v42 }
 0x8ec   :  { %3530 = vmatmul.mubr.f32.gmra.mrb[68].mxu1 %v3475_v40 }
 0x8ed   :  { %v3478_v46 = vpop.f32.mrb[70].mxu0  ;;  %4134 = vmatpush3.bf16.msra.mxu1 %v4131_v60 }
 0x8ee   :  { %v1637_v48 = vpop.f32.mrb[71].mxu0  ;;  %4136 = vmatprep.subr.bf16.mxu1 %v4135_v63 }
 0x8ef   :  { %3532 = vmatprep.mubr.f32.mxu1 %v1637_v48 }
 0x8f0   :  { %3533 = vmatmul.mubr.f32.gmra.mrb[70].mxu1 %v3478_v46 }
 0x8f1   :  { %v3481_v49 = vpop.f32.mrb[72].mxu0  ;;  %4138 = vmatpush3.bf16.msra.mxu1 %v4135_v63 }
 0x8f2   :  { %v1647_v51 = vpop.f32.mrb[73].mxu0  ;;  %4140 = vmatprep.subr.bf16.mxu1 %v4139_v3 }
 0x8f3   :  { %3535 = vmatprep.mubr.f32.mxu1 %v1647_v51 }
 0x8f4   :  { %3536 = vmatmul.mubr.f32.gmra.mrb[72].mxu1 %v3481_v49 }
 0x8f5   :  { %v3484_v0 = vpop.f32.mrb[74].mxu0  ;;  %4142 = vmatpush3.bf16.msra.mxu1 %v4139_v3 }
 0x8f6   :  { %v1657_v1 = vpop.f32.mrb[75].mxu0  ;;  %4144 = vmatprep.subr.bf16.mxu1 %v4143_v6 }
 0x8f7   :  { %3538 = vmatprep.mubr.f32.mxu1 %v1657_v1 }
 0x8f8   :  { %3539 = vmatmul.mubr.f32.gmra.mrb[74].mxu1 %v3484_v0 }
 0x8f9   :  { %v3487_v41 = vpop.f32.mrb[76].mxu0  ;;  %4146 = vmatpush3.bf16.msra.mxu1 %v4143_v6 }
 0x8fa   :  { %v1667_v2 = vpop.f32.mrb[77].mxu0  ;;  %4148 = vmatprep.subr.bf16.mxu1 %v4147_v10 }
 0x8fb   :  { %3541 = vmatprep.mubr.f32.mxu1 %v1667_v2 }
 0x8fc   :  { %3542 = vmatmul.mubr.f32.gmra.mrb[76].mxu1 %v3487_v41 }
 0x8fd   :  { %v3490_v47 = vpop.f32.mrb[78].mxu0  ;;  %4150 = vmatpush3.bf16.msra.mxu1 %v4147_v10 }
 0x8fe   :  { %v1677_v50 = vpop.f32.mrb[79].mxu0  ;;  %4152 = vmatprep.subr.bf16.mxu1 %v4151_v9 }
 0x8ff   :  { %3544 = vmatprep.mubr.f32.mxu1 %v1677_v50 }
 0x900   :  { %3545 = vmatmul.mubr.f32.gmra.mrb[78].mxu1 %v3490_v47 }
 0x901   :  { %4154 = vmatpush3.bf16.msra.mxu1 %v4151_v9 }
 0x9b7   :  { %v3525_v14 = vpop.f32.mrb[64].mxu1 }
 0x9b8   :  { %v1764_v15 = vadd.f32 %v3525_v14, %v4971_v13  ;;  %v1758_v16 = vpop.f32.mrb[65].mxu1 }
 0x9b9   :  { %v1759_v17 = vadd.f32 %v4971_v13, %v1758_v16 }
 0x9ba   :  { %v1838_v18 = vmax.f32 %v1764_v15, 0.0 }
 0x9bb   :  { %v1837_v19 = vmax.f32 %v1759_v17, 0.0  ;;  %v3528_v20 = vpop.f32.mrb[66].mxu1 }
 0x9bc   :  { %v1774_v36 = vadd.f32 %v3528_v20, %v4971_v13  ;;  %v1768_v37 = vpop.f32.mrb[67].mxu1 }
 0x9bd   :  { %v4091_v38 = vpack.c.bf16 %v1838_v18, %v1837_v19  ;;  %v1769_v39 = vadd.f32 %v4971_v13, %v1768_v37 }
 0x9be   :  { %v1840_v40 = vmax.f32 %v1774_v36, 0.0 }
 0x9bf   :  { %v1839_v42 = vmax.f32 %v1769_v39, 0.0  ;;  %v3531_v46 = vpop.f32.mrb[68].mxu1  ;;  %4092 = vmatprep.subr.bf16.mxu0 %v4091_v38  ;;  %v2184_v39 = vld [vmem:[#allocation16 + $0x10] sm:$0xff] }
 0x9c0   :  { %v1784_v48 = vadd.f32 %v3531_v46, %v4971_v13  ;;  %v1778_v49 = vpop.f32.mrb[69].mxu1  ;;  %4094 = vmatpush3.bf16.msra.mxu0 %v4091_v38  ;;  %v2183_v38 = vld [vmem:[#allocation16 + $0x8] sm:$0xff] }
 0x9c1   :  { %v4095_v51 = vpack.c.bf16 %v1840_v40, %v1839_v42  ;;  %v1779_v0 = vadd.f32 %v4971_v13, %v1778_v49  ;;  %v2185_v42 = vld [vmem:[#allocation16 + $0x18] sm:$0xff]  ;;  %v2187_v49 = vld [vmem:[#allocation16 + $0x28] sm:$0xff] }
 0x9c2   :  { %v1842_v1 = vmax.f32 %v1784_v48, 0.0  ;;  %v4159_v46 = vpack.c.bf16 %v2185_v42, %v2184_v39  ;;  %v2186_v48 = vld [vmem:[#allocation16 + $0x20] sm:$0xff] }
 0x9c3   :  { %v1841_v41 = vmax.f32 %v1779_v0, 0.0  ;;  %v3534_v2 = vpop.f32.mrb[70].mxu1  ;;  %4096 = vmatprep.subr.bf16.mxu0 %v4095_v51  ;;  %v2188_v0 = vld [vmem:[#allocation16 + $0x30] sm:$0xff] }
 0x9c4   :  { %v1794_v47 = vadd.f32 %v3534_v2, %v4971_v13  ;;  %v1788_v50 = vpop.f32.mrb[71].mxu1  ;;  %4098 = vmatpush3.bf16.msra.mxu0 %v4095_v51  ;;  %v4163_v51 = vpack.c.bf16 %v2187_v49, %v2186_v48  ;;  %v2190_v2 = vld [vmem:[#allocation16 + $0x40] sm:$0xff] }
 0x9c5   :  { %v4099_v52 = vpack.c.bf16 %v1842_v1, %v1841_v41  ;;  %v1789_v53 = vadd.f32 %v4971_v13, %v1788_v50  ;;  %v2189_v1 = vld [vmem:[#allocation16 + $0x38] sm:$0xff] }
 0x9c6   :  { %v1844_v54 = vmax.f32 %v1794_v47, 0.0  ;;  %v4167_v41 = vpack.c.bf16 %v2189_v1, %v2188_v0  ;;  %v2191_v47 = vld [vmem:[#allocation16 + $0x48] sm:$0xff] }
 0x9c7   :  { %v1843_v55 = vmax.f32 %v1789_v53, 0.0  ;;  %v3537_v56 = vpop.f32.mrb[72].mxu1  ;;  %4100 = vmatprep.subr.bf16.mxu0 %v4099_v52  ;;  %v4171_v50 = vpack.c.bf16 %v2191_v47, %v2190_v2  ;;  %v2193_v53 = vld [vmem:[#allocation16 + $0x58] sm:$0xff] }
 0x9c8   :  { %v1804_v57 = vadd.f32 %v3537_v56, %v4971_v13  ;;  %v1798_v58 = vpop.f32.mrb[73].mxu1  ;;  %4102 = vmatpush3.bf16.msra.mxu0 %v4099_v52  ;;  %v2192_v52 = vld [vmem:[#allocation16 + $0x50] sm:$0xff]  ;;  %v2195_v56 = vld [vmem:[#allocation16 + $0x68] sm:$0xff] }
 0x9c9   :  { %v4103_v59 = vpack.c.bf16 %v1844_v54, %v1843_v55  ;;  %v1799_v60 = vadd.f32 %v4971_v13, %v1798_v58  ;;  %v4175_v54 = vpack.c.bf16 %v2193_v53, %v2192_v52  ;;  %v2194_v55 = vld [vmem:[#allocation16 + $0x60] sm:$0xff] }
 0x9ca   :  { %v1846_v61 = vmax.f32 %v1804_v57, 0.0  ;;  %v4179_v57 = vpack.c.bf16 %v2195_v56, %v2194_v55 }
 0x9cb   :  { %v1845_v62 = vmax.f32 %v1799_v60, 0.0  ;;  %v3540_v63 = vpop.f32.mrb[74].mxu1  ;;  %4104 = vmatprep.subr.bf16.mxu0 %v4103_v59 }
 0x9cc   :  { %v1814_v44 = vadd.f32 %v3540_v63, %v4971_v13  ;;  %v1808_v43 = vpop.f32.mrb[75].mxu1  ;;  %4106 = vmatpush3.bf16.msra.mxu0 %v4103_v59 }
 0x9cd   :  { %v4107_v3 = vpack.c.bf16 %v1846_v61, %v1845_v62  ;;  %v1809_v4 = vadd.f32 %v4971_v13, %v1808_v43 }
 0x9ce   :  { %v1848_v5 = vmax.f32 %v1814_v44, 0.0 }
 0x9cf   :  { %v1847_v6 = vmax.f32 %v1809_v4, 0.0  ;;  %v3543_v7 = vpop.f32.mrb[76].mxu1  ;;  %4108 = vmatprep.subr.bf16.mxu0 %v4107_v3 }
 0x9d0   :  { %v1824_v8 = vadd.f32 %v3543_v7, %v4971_v13  ;;  %v1818_v10 = vpop.f32.mrb[77].mxu1  ;;  %4110 = vmatpush3.bf16.msra.mxu0 %v4107_v3 }
 0x9d1   :  { %v4111_v11 = vpack.c.bf16 %v1848_v5, %v1847_v6  ;;  %v1819_v12 = vadd.f32 %v4971_v13, %v1818_v10 }
 0x9d2   :  { %v1850_v9 = vmax.f32 %v1824_v8, 0.0 }
 0x9d3   :  { %v1849_v14 = vmax.f32 %v1819_v12, 0.0  ;;  %v3546_v15 = vpop.f32.mrb[78].mxu1  ;;  %4112 = vmatprep.subr.bf16.mxu0 %v4111_v11  ;;  %v2196_v12 = vld [vmem:[#allocation16 + $0x70] sm:$0xff] }
 0x9d4   :  { %v1834_v16 = vadd.f32 %v3546_v15, %v4971_v13  ;;  %v1828_v17 = vpop.f32.mrb[79].mxu1  ;;  %4114 = vmatpush3.bf16.msra.mxu0 %v4111_v11  ;;  %v2537_v15 = vld [vmem:[%s5055_s14] ss:$0 sm:$0xff] }
 0x9d5   :  { %v4115_v18 = vpack.c.bf16 %v1850_v9, %v1849_v14  ;;  %v1829_v19 = vadd.f32 %v4971_v13, %v1828_v17  ;;  %v2182_v13 = vld [vmem:[#allocation16] sm:$0xff]  ;;  %v2197_v9 = vld [vmem:[#allocation16 + $0x78] sm:$0xff] }
 0x9d6   :  { %v1852_v20 = vmax.f32 %v1834_v16, 0.0  ;;  %v4155_v40 = vpack.c.bf16 %v2183_v38, %v2182_v13  ;;  %v4183_v14 = vpack.c.bf16 %v2197_v9, %v2196_v12 }
 0x9d7   :  { %v1851_v36 = vmax.f32 %v1829_v19, 0.0  ;;  %4116 = vmatprep.subr.bf16.mxu0 %v4115_v18 }
 0x9d8   :  { %4118 = vmatpush3.bf16.msra.mxu0 %v4115_v18 }
 0x9d9   :  { %v4119_v37 = vpack.c.bf16 %v1852_v20, %v1851_v36 }
 0x9db   :  { %4120 = vmatprep.subr.bf16.mxu0 %v4119_v37 }
 0x9dc   :  { %4122 = vmatpush3.bf16.msra.mxu0 %v4119_v37 }
 0x9dd   :  { %4156 = vmatprep.subr.bf16.mxu0 %v4155_v40 }
 0x9df   :  { %3580 = vmatmul.mubr.f32.vlgmr.msra.gmra.mrb[80].mxu0 %v4922_v21 }
 0x9e0   :  { %3582 = vmatprep.mubr.f32.mxu0 %v4925_v22  ;;  %4158 = vmatpush3.bf16.msra.mxu0 %v4155_v40 }
 0x9e1   :  { %4160 = vmatprep.subr.bf16.mxu0 %v4159_v46 }
 0x9e3   :  { %3583 = vmatmul.mubr.f32.gmra.mrb[82].mxu0 %v4928_v23 }
 0x9e4   :  { %3585 = vmatprep.mubr.f32.mxu0 %v4931_v24  ;;  %4162 = vmatpush3.bf16.msra.mxu0 %v4159_v46 }
 0x9e5   :  { %4164 = vmatprep.subr.bf16.mxu0 %v4163_v51 }
 0x9e7   :  { %3586 = vmatmul.mubr.f32.gmra.mrb[84].mxu0 %v4934_v25 }
 0x9e8   :  { %3588 = vmatprep.mubr.f32.mxu0 %v4937_v26  ;;  %4166 = vmatpush3.bf16.msra.mxu0 %v4163_v51 }
 0x9e9   :  { %4168 = vmatprep.subr.bf16.mxu0 %v4167_v41 }
 0x9eb   :  { %3589 = vmatmul.mubr.f32.gmra.mrb[86].mxu0 %v4940_v27 }
 0x9ec   :  { %3591 = vmatprep.mubr.f32.mxu0 %v4943_v28  ;;  %4170 = vmatpush3.bf16.msra.mxu0 %v4167_v41 }
 0x9ed   :  { %4172 = vmatprep.subr.bf16.mxu0 %v4171_v50 }
 0x9ef   :  { %3592 = vmatmul.mubr.f32.gmra.mrb[88].mxu0 %v4946_v29 }
 0x9f0   :  { %3594 = vmatprep.mubr.f32.mxu0 %v4949_v30  ;;  %4174 = vmatpush3.bf16.msra.mxu0 %v4171_v50 }
 0x9f1   :  { %4176 = vmatprep.subr.bf16.mxu0 %v4175_v54 }
 0x9f3   :  { %3595 = vmatmul.mubr.f32.gmra.mrb[90].mxu0 %v4952_v31 }
 0x9f4   :  { %3597 = vmatprep.mubr.f32.mxu0 %v4955_v32  ;;  %4178 = vmatpush3.bf16.msra.mxu0 %v4175_v54 }
 0x9f5   :  { %4180 = vmatprep.subr.bf16.mxu0 %v4179_v57 }
 0x9f7   :  { %3598 = vmatmul.mubr.f32.gmra.mrb[92].mxu0 %v4958_v33 }
 0x9f8   :  { %3600 = vmatprep.mubr.f32.mxu0 %v4961_v34  ;;  %4182 = vmatpush3.bf16.msra.mxu0 %v4179_v57 }
 0x9f9   :  { %4184 = vmatprep.subr.bf16.mxu0 %v4183_v14 }
 0x9fb   :  { %3601 = vmatmul.mubr.f32.gmra.mrb[94].mxu0 %v4964_v35 }
 0x9fc   :  { %4186 = vmatpush3.bf16.msra.mxu0 %v4183_v14 }
 0xab2   :  { %v3581_v58 = vpop.f32.mrb[80].mxu0 }
 0xab3   :  { %v1936_v59 = vpop.f32.mrb[81].mxu0 }
 0xab4   :  { %3635 = vmatprep.mubr.f32.mxu1 %v1936_v59 }
 0xab5   :  { %3636 = vmatmul.mubr.f32.vlgmr.msra.gmra.mrb[80].mxu1 %v3581_v58 }
 0xab6   :  { %v3584_v60 = vpop.f32.mrb[82].mxu0 }
 0xab7   :  { %v1946_v61 = vpop.f32.mrb[83].mxu0 }
 0xab8   :  { %3638 = vmatprep.mubr.f32.mxu1 %v1946_v61 }
 0xab9   :  { %3639 = vmatmul.mubr.f32.gmra.mrb[82].mxu1 %v3584_v60 }
 0xaba   :  { %v3587_v62 = vpop.f32.mrb[84].mxu0 }
 0xabb   :  { %v1956_v63 = vpop.f32.mrb[85].mxu0 }
 0xabc   :  { %3641 = vmatprep.mubr.f32.mxu1 %v1956_v63 }
 0xabd   :  { %3642 = vmatmul.mubr.f32.gmra.mrb[84].mxu1 %v3587_v62 }
 0xabe   :  { %v3590_v44 = vpop.f32.mrb[86].mxu0 }
 0xabf   :  { %v1966_v43 = vpop.f32.mrb[87].mxu0 }
 0xac0   :  { %3644 = vmatprep.mubr.f32.mxu1 %v1966_v43 }
 0xac1   :  { %3645 = vmatmul.mubr.f32.gmra.mrb[86].mxu1 %v3590_v44 }
 0xac2   :  { %v3593_v3 = vpop.f32.mrb[88].mxu0 }
 0xac3   :  { %v1976_v4 = vpop.f32.mrb[89].mxu0 }
 0xac4   :  { %3647 = vmatprep.mubr.f32.mxu1 %v1976_v4 }
 0xac5   :  { %3648 = vmatmul.mubr.f32.gmra.mrb[88].mxu1 %v3593_v3 }
 0xac6   :  { %v3596_v5 = vpop.f32.mrb[90].mxu0 }
 0xac7   :  { %v1986_v6 = vpop.f32.mrb[91].mxu0 }
 0xac8   :  { %3650 = vmatprep.mubr.f32.mxu1 %v1986_v6 }
 0xac9   :  { %3651 = vmatmul.mubr.f32.gmra.mrb[90].mxu1 %v3596_v5 }
 0xaca   :  { %v3599_v7 = vpop.f32.mrb[92].mxu0 }
 0xacb   :  { %v1996_v8 = vpop.f32.mrb[93].mxu0 }
 0xacc   :  { %3653 = vmatprep.mubr.f32.mxu1 %v1996_v8 }
 0xacd   :  { %3654 = vmatmul.mubr.f32.gmra.mrb[92].mxu1 %v3599_v7 }
 0xace   :  { %v3602_v10 = vpop.f32.mrb[94].mxu0 }
 0xacf   :  { %v2006_v11 = vpop.f32.mrb[95].mxu0 }
 0xad0   :  { %3656 = vmatprep.mubr.f32.mxu1 %v2006_v11 }
 0xad1   :  { %3657 = vmatmul.mubr.f32.gmra.mrb[94].mxu1 %v3602_v10 }
 0xad2   :  { %3747 = vmatprep.mubr.f32.mxu1 %v4898_v45 }
 0xb88   :  { %v3637_v16 = vpop.f32.mrb[80].mxu1 }
 0xb89   :  { %v2093_v17 = vadd.f32 %v3637_v16, %v2537_v15  ;;  %v2087_v18 = vpop.f32.mrb[81].mxu1 }
 0xb8a   :  { %v2088_v19 = vadd.f32 %v2537_v15, %v2087_v18 }
 0xb8b   :  { %v2167_v37 = vmax.f32 %v2093_v17, 0.0 }
 0xb8c   :  { %v2166_v20 = vmax.f32 %v2088_v19, 0.0  ;;  %v3640_v36 = vpop.f32.mrb[82].mxu1 }
 0xb8d   :  { %v2103_v13 = vadd.f32 %v3640_v36, %v2537_v15  ;;  %v2097_v38 = vpop.f32.mrb[83].mxu1 }
 0xb8e   :  { %v2098_v39 = vadd.f32 %v2537_v15, %v2097_v38  ;;  %3691 = vmatprep.mubr.f32.mxu0 %v2166_v20 }
 0xb8f   :  { %3692 = vmatmul.mubr.f32.vlgmr.msra.gmra.mrb[96].mxu0 %v2167_v37  ;;  %v2169_v42 = vmax.f32 %v2103_v13, 0.0 }
 0xb90   :  { %v2168_v45 = vmax.f32 %v2098_v39, 0.0  ;;  %v3643_v40 = vpop.f32.mrb[84].mxu1 }
 0xb91   :  { %v2113_v46 = vadd.f32 %v3643_v40, %v2537_v15  ;;  %v2107_v48 = vpop.f32.mrb[85].mxu1 }
 0xb92   :  { %v2108_v49 = vadd.f32 %v2537_v15, %v2107_v48  ;;  %3694 = vmatprep.mubr.f32.mxu0 %v2168_v45 }
 0xb93   :  { %3695 = vmatmul.mubr.f32.gmra.mrb[98].mxu0 %v2169_v42  ;;  %v2171_v1 = vmax.f32 %v2113_v46, 0.0 }
 0xb94   :  { %v2170_v51 = vmax.f32 %v2108_v49, 0.0  ;;  %v3646_v0 = vpop.f32.mrb[86].mxu1 }
 0xb95   :  { %v2123_v41 = vadd.f32 %v3646_v0, %v2537_v15  ;;  %v2117_v2 = vpop.f32.mrb[87].mxu1 }
 0xb96   :  { %v2118_v47 = vadd.f32 %v2537_v15, %v2117_v2  ;;  %3697 = vmatprep.mubr.f32.mxu0 %v2170_v51 }
 0xb97   :  { %3698 = vmatmul.mubr.f32.gmra.mrb[100].mxu0 %v2171_v1  ;;  %v2173_v53 = vmax.f32 %v2123_v41, 0.0 }
 0xb98   :  { %v2172_v50 = vmax.f32 %v2118_v47, 0.0  ;;  %v3649_v52 = vpop.f32.mrb[88].mxu1 }
 0xb99   :  { %v2133_v54 = vadd.f32 %v3649_v52, %v2537_v15  ;;  %v2127_v55 = vpop.f32.mrb[89].mxu1 }
 0xb9a   :  { %v2128_v56 = vadd.f32 %v2537_v15, %v2127_v55  ;;  %3700 = vmatprep.mubr.f32.mxu0 %v2172_v50 }
 0xb9b   :  { %3701 = vmatmul.mubr.f32.gmra.mrb[102].mxu0 %v2173_v53  ;;  %v2175_v59 = vmax.f32 %v2133_v54, 0.0 }
 0xb9c   :  { %v2174_v57 = vmax.f32 %v2128_v56, 0.0  ;;  %v3652_v58 = vpop.f32.mrb[90].mxu1 }
 0xb9d   :  { %v2143_v60 = vadd.f32 %v3652_v58, %v2537_v15  ;;  %v2137_v61 = vpop.f32.mrb[91].mxu1 }
 0xb9e   :  { %v2138_v62 = vadd.f32 %v2537_v15, %v2137_v61  ;;  %3703 = vmatprep.mubr.f32.mxu0 %v2174_v57 }
 0xb9f   :  { %3704 = vmatmul.mubr.f32.gmra.mrb[104].mxu0 %v2175_v59  ;;  %v2177_v43 = vmax.f32 %v2143_v60, 0.0 }
 0xba0   :  { %v2176_v63 = vmax.f32 %v2138_v62, 0.0  ;;  %v3655_v44 = vpop.f32.mrb[92].mxu1 }
 0xba1   :  { %v2153_v3 = vadd.f32 %v3655_v44, %v2537_v15  ;;  %v2147_v4 = vpop.f32.mrb[93].mxu1 }
 0xba2   :  { %v2148_v5 = vadd.f32 %v2537_v15, %v2147_v4  ;;  %3706 = vmatprep.mubr.f32.mxu0 %v2176_v63 }
 0xba3   :  { %3707 = vmatmul.mubr.f32.gmra.mrb[106].mxu0 %v2177_v43  ;;  %v2179_v8 = vmax.f32 %v2153_v3, 0.0 }
 0xba4   :  { %v2178_v6 = vmax.f32 %v2148_v5, 0.0  ;;  %v3658_v7 = vpop.f32.mrb[94].mxu1 }
 0xba5   :  { %v2163_v10 = vadd.f32 %v3658_v7, %v2537_v15  ;;  %v2157_v11 = vpop.f32.mrb[95].mxu1 }
 0xba6   :  { %v2158_v12 = vadd.f32 %v2537_v15, %v2157_v11  ;;  %3709 = vmatprep.mubr.f32.mxu0 %v2178_v6 }
 0xba7   :  { %3710 = vmatmul.mubr.f32.gmra.mrb[108].mxu0 %v2179_v8  ;;  %v2181_v14 = vmax.f32 %v2163_v10, 0.0 }
 0xba8   :  { %v2180_v9 = vmax.f32 %v2158_v12, 0.0 }
 0xbaa   :  { %3712 = vmatprep.mubr.f32.mxu0 %v2180_v9 }
 0xbab   :  { %3713 = vmatmul.mubr.f32.gmra.mrb[110].mxu0 %v2181_v14 }
 0xc62   :  { %v3693_v16 = vpop.f32.mrb[96].mxu0 }
 0xc63   :  { %v2265_v17 = vpop.f32.mrb[97].mxu0 }
 0xc64   :  { %v4187_v18 = vpack.c.bf16 %v3693_v16, %v2265_v17 }
 0xc66   :  { %v3696_v19 = vpop.f32.mrb[98].mxu0  ;;  %4188 = vmatprep.subr.bf16.mxu1 %v4187_v18 }
 0xc67   :  { %v2275_v20 = vpop.f32.mrb[99].mxu0  ;;  %4190 = vmatpush3.bf16.msra.mxu1 %v4187_v18 }
 0xc68   :  { %v4191_v36 = vpack.c.bf16 %v3696_v19, %v2275_v20 }
 0xc6a   :  { %v3699_v37 = vpop.f32.mrb[100].mxu0  ;;  %4192 = vmatprep.subr.bf16.mxu1 %v4191_v36 }
 0xc6b   :  { %v2285_v13 = vpop.f32.mrb[101].mxu0  ;;  %4194 = vmatpush3.bf16.msra.mxu1 %v4191_v36 }
 0xc6c   :  { %v4195_v38 = vpack.c.bf16 %v3699_v37, %v2285_v13 }
 0xc6e   :  { %v3702_v15 = vpop.f32.mrb[102].mxu0  ;;  %4196 = vmatprep.subr.bf16.mxu1 %v4195_v38 }
 0xc6f   :  { %v2295_v39 = vpop.f32.mrb[103].mxu0  ;;  %4198 = vmatpush3.bf16.msra.mxu1 %v4195_v38 }
 0xc70   :  { %v4199_v45 = vpack.c.bf16 %v3702_v15, %v2295_v39 }
 0xc72   :  { %v3705_v40 = vpop.f32.mrb[104].mxu0  ;;  %4200 = vmatprep.subr.bf16.mxu1 %v4199_v45 }
 0xc73   :  { %v2305_v42 = vpop.f32.mrb[105].mxu0  ;;  %4202 = vmatpush3.bf16.msra.mxu1 %v4199_v45 }
 0xc74   :  { %v4203_v46 = vpack.c.bf16 %v3705_v40, %v2305_v42 }
 0xc76   :  { %v3708_v48 = vpop.f32.mrb[106].mxu0  ;;  %4204 = vmatprep.subr.bf16.mxu1 %v4203_v46 }
 0xc77   :  { %v2315_v49 = vpop.f32.mrb[107].mxu0  ;;  %4206 = vmatpush3.bf16.msra.mxu1 %v4203_v46 }
 0xc78   :  { %v4207_v51 = vpack.c.bf16 %v3708_v48, %v2315_v49 }
 0xc7a   :  { %v3711_v0 = vpop.f32.mrb[108].mxu0  ;;  %4208 = vmatprep.subr.bf16.mxu1 %v4207_v51 }
 0xc7b   :  { %v2325_v1 = vpop.f32.mrb[109].mxu0  ;;  %4210 = vmatpush3.bf16.msra.mxu1 %v4207_v51 }
 0xc7c   :  { %v4211_v41 = vpack.c.bf16 %v3711_v0, %v2325_v1 }
 0xc7e   :  { %v3714_v2 = vpop.f32.mrb[110].mxu0  ;;  %4212 = vmatprep.subr.bf16.mxu1 %v4211_v41 }
 0xc7f   :  { %v2335_v47 = vpop.f32.mrb[111].mxu0  ;;  %4214 = vmatpush3.bf16.msra.mxu1 %v4211_v41 }
 0xc80   :  { %v4215_v50 = vpack.c.bf16 %v3714_v2, %v2335_v47 }
 0xc82   :  { %4216 = vmatprep.subr.bf16.mxu1 %v4215_v50 }
 0xc83   :  { %4218 = vmatpush3.bf16.msra.mxu1 %v4215_v50 }
 0xc86   :  { %3748 = vmatmul.mubr.f32.vlgmr.msra.gmra.mrb[96].mxu1 %v4922_v21  ;;  %v2538_v21 = vld [vmem:[%s5056_s15] ss:$0 sm:$0xff]  ;;  %s4490_s15 = smov [#allocation17]  }
 0xc87   :  { %3750 = vmatprep.mubr.f32.mxu1 %v4925_v22  ;;  %s2516_s27 = sshll.u32 %s4490_s15, 4  ;;  %s2517_s27 = int_to_ptr.vmem [resolvable:$true] %s2516_s27 }
 0xc88   :  { %s4445_s5 = scalar_lea.vmem %s2517_s27, 2048  ;;  %p4450_p3 = scmp.lt.s32.totalorder %s2517_s27, %s2517_s27 }
 0xc89   :  { %p4446_p2 = scmp.ne.s32.totalorder %s2517_s27, %s4445_s5  ;;  %p4451_p4 = scmp.lt.s32.totalorder %s4445_s5, %s4445_s5 }
 0xc8a   :  { %3751 = vmatmul.mubr.f32.gmra.mrb[98].mxu1 %v4928_v23 }
 0xc8b   :  { %3753 = vmatprep.mubr.f32.mxu1 %v4931_v24  ;;  %p4452_p5 = por %p4451_p4, %p4450_p3 }
 0xc8d   :  { %p4453_p6 = pnand %p4452_p5, %p4446_p2 }
 0xc8e   :  { %3754 = vmatmul.mubr.f32.gmra.mrb[100].mxu1 %v4934_v25 }
 0xc8f   :  { %3756 = vmatprep.mubr.f32.mxu1 %v4937_v26 }
 0xc92   :  { %3757 = vmatmul.mubr.f32.gmra.mrb[102].mxu1 %v4940_v27 }
 0xc93   :  { %3759 = vmatprep.mubr.f32.mxu1 %v4943_v28 }
 0xc96   :  { %3760 = vmatmul.mubr.f32.gmra.mrb[104].mxu1 %v4946_v29 }
 0xc97   :  { %3762 = vmatprep.mubr.f32.mxu1 %v4949_v30 }
 0xc9a   :  { %3763 = vmatmul.mubr.f32.gmra.mrb[106].mxu1 %v4952_v31 }
 0xc9b   :  { %3765 = vmatprep.mubr.f32.mxu1 %v4955_v32 }
 0xc9e   :  { %3766 = vmatmul.mubr.f32.gmra.mrb[108].mxu1 %v4958_v33 }
 0xc9f   :  { %3768 = vmatprep.mubr.f32.mxu1 %v4961_v34 }
 0xca2   :  { %3769 = vmatmul.mubr.f32.gmra.mrb[110].mxu1 %v4964_v35 }
 0xd59   :  { %v3749_v22 = vpop.f32.mrb[96].mxu1 }
 0xd5a   :  { %v2422_v23 = vadd.f32 %v3749_v22, %v2538_v21  ;;  %v2416_v24 = vpop.f32.mrb[97].mxu1 }
 0xd5b   :  { %v2417_v25 = vadd.f32 %v2538_v21, %v2416_v24 }
 0xd5c   :  { %2496 = vst [vmem:[#allocation17 + $0x8] sm:$0xff] %v2422_v23 }
 0xd5d   :  { %2495 = vst [vmem:[#allocation17] sm:$0xff] %v2417_v25  ;;  %v3752_v26 = vpop.f32.mrb[98].mxu1 }
 0xd5e   :  { %v2432_v27 = vadd.f32 %v3752_v26, %v2538_v21  ;;  %v2426_v28 = vpop.f32.mrb[99].mxu1 }
 0xd5f   :  { %v2427_v29 = vadd.f32 %v2538_v21, %v2426_v28 }
 0xd60   :  { %2498 = vst [vmem:[#allocation17 + $0x18] sm:$0xff] %v2432_v27 }
 0xd61   :  { %2497 = vst [vmem:[#allocation17 + $0x10] sm:$0xff] %v2427_v29  ;;  %v3755_v30 = vpop.f32.mrb[100].mxu1 }
 0xd62   :  { %v2442_v31 = vadd.f32 %v3755_v30, %v2538_v21  ;;  %v2436_v32 = vpop.f32.mrb[101].mxu1 }
 0xd63   :  { %v2437_v33 = vadd.f32 %v2538_v21, %v2436_v32 }
 0xd64   :  { %2500 = vst [vmem:[#allocation17 + $0x28] sm:$0xff] %v2442_v31 }
 0xd65   :  { %2499 = vst [vmem:[#allocation17 + $0x20] sm:$0xff] %v2437_v33  ;;  %v3758_v34 = vpop.f32.mrb[102].mxu1 }
 0xd66   :  { %v2452_v35 = vadd.f32 %v3758_v34, %v2538_v21  ;;  %v2446_v52 = vpop.f32.mrb[103].mxu1 }
 0xd67   :  { %v2447_v53 = vadd.f32 %v2538_v21, %v2446_v52 }
 0xd68   :  { %2502 = vst [vmem:[#allocation17 + $0x38] sm:$0xff] %v2452_v35 }
 0xd69   :  { %2501 = vst [vmem:[#allocation17 + $0x30] sm:$0xff] %v2447_v53  ;;  %v3761_v54 = vpop.f32.mrb[104].mxu1 }
 0xd6a   :  { %v2462_v55 = vadd.f32 %v3761_v54, %v2538_v21  ;;  %v2456_v56 = vpop.f32.mrb[105].mxu1 }
 0xd6b   :  { %v2457_v57 = vadd.f32 %v2538_v21, %v2456_v56 }
 0xd6c   :  { %2504 = vst [vmem:[#allocation17 + $0x48] sm:$0xff] %v2462_v55 }
 0xd6d   :  { %2503 = vst [vmem:[#allocation17 + $0x40] sm:$0xff] %v2457_v57  ;;  %v3764_v58 = vpop.f32.mrb[106].mxu1 }
 0xd6e   :  { %v2472_v59 = vadd.f32 %v3764_v58, %v2538_v21  ;;  %v2466_v60 = vpop.f32.mrb[107].mxu1 }
 0xd6f   :  { %v2467_v61 = vadd.f32 %v2538_v21, %v2466_v60 }
 0xd70   :  { %2506 = vst [vmem:[#allocation17 + $0x58] sm:$0xff] %v2472_v59 }
 0xd71   :  { %2505 = vst [vmem:[#allocation17 + $0x50] sm:$0xff] %v2467_v61  ;;  %v3767_v62 = vpop.f32.mrb[108].mxu1 }
 0xd72   :  { %v2482_v63 = vadd.f32 %v3767_v62, %v2538_v21  ;;  %v2476_v44 = vpop.f32.mrb[109].mxu1 }
 0xd73   :  { %v2477_v43 = vadd.f32 %v2538_v21, %v2476_v44 }
 0xd74   :  { %2508 = vst [vmem:[#allocation17 + $0x68] sm:$0xff] %v2482_v63 }
 0xd75   :  { %2507 = vst [vmem:[#allocation17 + $0x60] sm:$0xff] %v2477_v43  ;;  %v3770_v3 = vpop.f32.mrb[110].mxu1 }
 0xd76   :  { %v2492_v4 = vadd.f32 %v3770_v3, %v2538_v21  ;;  %v2486_v5 = vpop.f32.mrb[111].mxu1 }
 0xd77   :  { %v2487_v6 = vadd.f32 %v2538_v21, %v2486_v5 }
 0xd78   :  { %2510 = vst [vmem:[#allocation17 + $0x78] sm:$0xff] %v2492_v4 }
 0xd79   :  { %2509 = vst [vmem:[#allocation17 + $0x70] sm:$0xff] %v2487_v6 }
 0xd7a   :  { %4456 = shalt.err (!%p4453_p6)
}
 0xd7b   :  { %s4457_s3 = scalar_lea.hbm %s5057_s16, 2048 }
 0xd7c   :  { %p4458_p7 = scmp.ne.s32.totalorder %s5057_s16, %s4457_s3  ;;  %p4461_p8 = scmp.lt.u32.totalorder %s4457_s3, %s5057_s16 }
 0xd7e   :  { %p4463_p9 = pnand %p4461_p8, %p4458_p7 }
 0xd80   :  { %4466 = shalt.err (!%p4463_p9)
}
 0xd81   :  { %2522 = dma.vmem_to_hbm [thread:$0]  %s2517_s27, 2048, %s5057_s16, [#allocation4], %s4481_s18, %s4481_s18, %s4482_s19  }
 0xd82   :  { %4477 = dma.done.wait [#allocation4], 2048  }
 0xd83   :  { %4478 = vsyncadd [#allocation4], 4294965248 }
 0xd84   :  { %2526 = vsyncpa [#allocation3], 1 }
 0xd85   :  { %2527 = vsyncpa [#allocation6], 1 }
 0xd86   :  { %2528 = vsyncpa [#allocation9], 1 }
 0xd87   :  { %2529 = vsyncpa [#allocation12], 1 }
 0xd88   :  { %2530 = vsyncpa [#allocation15], 1 }
 0xd89   :  { %2531 = vsyncpa [#allocation4], 1 }

</bundles_post_ra>
